<compile_context>
chip_gen: v7x
topology: tpu7x:2x2x1
jax: 0.10.0
libtpu: 0.0.40
codegen_flags: <defaults>
</compile_context>

<pallas_src>
import jax
import jax.numpy as jnp
from jax import lax
from jax.experimental import pallas as pl
from jax.experimental.pallas import tpu as pltpu


def make_lstm_attention_kernel(T, B, D_in, H, O, num_layers):
    """Build the Pallas kernel for fixed static shapes."""
    G = 4 * H

    def kernel(*refs):
        # refs: x, [wih_l, whh_l, b_l] * num_layers, wfc, bfc, out,
        #       buf0, buf1, pre_gates
        x_ref = refs[0]
        layer_refs = refs[1:1 + 3 * num_layers]
        wfc_ref = refs[1 + 3 * num_layers]
        bfc_ref = refs[2 + 3 * num_layers]
        out_ref = refs[3 + 3 * num_layers]
        buf0_ref = refs[4 + 3 * num_layers]          # (T, B, H) ping
        buf1_ref = refs[5 + 3 * num_layers]          # (T, B, H) pong
        pre_ref = refs[6 + 3 * num_layers]           # (T, B, 4H) pre-gates
        bufs = (buf0_ref, buf1_ref)

        # Lane mask selecting the g-gate (tanh) lanes [2H, 3H); hoisted once
        # (JAX does not CSE broadcasts inside loops).
        lane = lax.broadcasted_iota(jnp.int32, (B, G), 1)
        is_g_lane = (lane >= 2 * H) & (lane < 3 * H)

        def run_layer(l, in_ref, d_in):
            wih = layer_refs[3 * l][...]             # (d_in, 4H) bf16
            whh = layer_refs[3 * l + 1][...]         # (H, 4H)    bf16
            b = layer_refs[3 * l + 2][...]           # (1, 4H)    f32 = b_ih+b_hh
            out_buf = bufs[l % 2]

            # Hoisted input projection + bias: one batched matmul per layer.
            x_flat = in_ref[...].reshape(T * B, d_in).astype(jnp.bfloat16)
            pre = jnp.dot(x_flat, wih, preferred_element_type=jnp.float32) + b
            pre_ref[...] = pre.reshape(T, B, G)

            h = jnp.zeros((B, H), jnp.float32)
            c = jnp.zeros((B, H), jnp.float32)
            # Full static unroll of the recurrence (T is static and tiny);
            # equivalent to lax.fori_loop(0, T, step, ..., unroll=True) but
            # with static VMEM offsets for pre_ref / out_buf.
            for t in range(T):
                g_lin = pre_ref[t] + jnp.dot(h.astype(jnp.bfloat16), whh,
                                             preferred_element_type=jnp.float32)
                # Whole-vreg nonlinearities: one sigmoid + one tanh over
                # (B, 4H); the lane mask picks tanh for the g gate.
                sig = jax.nn.sigmoid(g_lin)
                tnh = jnp.tanh(g_lin)
                act = jnp.where(is_g_lane, tnh, sig)
                i_g = act[:, 0 * H:1 * H]
                f_g = act[:, 1 * H:2 * H]
                g_g = act[:, 2 * H:3 * H]
                o_g = act[:, 3 * H:4 * H]
                c = f_g * c + i_g * g_g
                h = o_g * jnp.tanh(c)
                out_buf[t] = h                       # layer output, time-major

        # Layer 0 reads x; layer l reads the (l-1)%2 buffer, writes l%2.
        run_layer(0, x_ref, D_in)
        for l in range(1, num_layers):
            run_layer(l, bufs[(l - 1) % 2], H)

        lstm_out = bufs[(num_layers - 1) % 2][...]   # (T, B, H) f32

        # attention_weights = softmax over T of mean over H.
        scores_bt = jnp.mean(lstm_out, axis=2).T     # (B, T)
        m = jnp.max(scores_bt, axis=1, keepdims=True)
        e = jnp.exp(scores_bt - m)
        w_bt = e / jnp.sum(e, axis=1, keepdims=True)  # (B, T)

        # attention_output = bmm(w (B,1,T), lstm_out (B,T,H)) -> (B, H).
        # Contraction form (MXU), no (T,B,H) broadcast temporary; B is tiny so
        # the per-row loop is fully static.
        # TODO(synk): for large B, switch to a batch-major buffer +
        # jnp.einsum('bt,bth->bh') and a parallel batch grid (v7x: 2 TCs).
        rows = [jnp.dot(w_bt[b:b + 1, :], lstm_out[:, b, :],
                        preferred_element_type=jnp.float32)
                for b in range(B)]
        attn_out = jnp.concatenate(rows, axis=0)     # (B, H)

        out_ref[...] = (jnp.dot(attn_out.astype(jnp.bfloat16), wfc_ref[...],
                                preferred_element_type=jnp.float32)
                        + bfc_ref[...])

    return kernel


def lstm_with_attention(x, layer_params, wfc, bfc):
    """x: (B, T, input_size) float32 (PyTorch batch_first convention)."""
    B, T, D_in = x.shape
    H = layer_params[0][1].shape[1]       # weight_hh_l0: (4H, H)
    O = wfc.shape[0]
    num_layers = len(layer_params)

    x_t = jnp.transpose(x, (1, 0, 2)).astype(jnp.float32)   # (T, B, D) time-major
    inputs = [x_t]
    for (wih, whh, bih, bhh) in layer_params:
        inputs += [wih.T.astype(jnp.bfloat16),               # (D, 4H)  bf16 weights
                   whh.T.astype(jnp.bfloat16),               # (H, 4H)
                   (bih + bhh)[None, :].astype(jnp.float32)]  # (1, 4H) fused bias
    inputs += [wfc.T.astype(jnp.bfloat16), bfc[None, :].astype(jnp.float32)]

    kernel = make_lstm_attention_kernel(T, B, D_in, H, O, num_layers)
    # Everything is VMEM-resident (a few KB at these shapes).
    # TODO(synk): at production shapes, tile B (grid + dimension_semantics
    # ("parallel",)) and T via BlockSpecs instead of whole-array residency.
    return pl.pallas_call(
        kernel,
        out_shape=jax.ShapeDtypeStruct((B, O), jnp.float32),
        in_specs=[pl.BlockSpec(memory_space=pltpu.MemorySpace.VMEM)
                  for _ in inputs],
        out_specs=pl.BlockSpec(memory_space=pltpu.MemorySpace.VMEM),
        scratch_shapes=[pltpu.VMEM((T, B, H), jnp.float32),      # layer out ping
                        pltpu.VMEM((T, B, H), jnp.float32),      # layer out pong
                        pltpu.VMEM((T, B, 4 * H), jnp.float32)],  # pre-gates
        compiler_params=pltpu.CompilerParams(
            vmem_limit_bytes=32 * 1024 * 1024),
    )(*inputs)


def ref_forward(x, layer_params, wfc, bfc):
    """Pure-JAX fp32 reference matching torch.nn.LSTM + attention + fc."""
    B, T, _ = x.shape
    seq = x
    for (wih, whh, bih, bhh) in layer_params:
        H = whh.shape[1]
        h = jnp.zeros((B, H), jnp.float32)
        c = jnp.zeros((B, H), jnp.float32)
        hs = []
        for t in range(T):
            gates = seq[:, t, :] @ wih.T + h @ whh.T + bih + bhh
            i = jax.nn.sigmoid(gates[:, 0 * H:1 * H])
            f = jax.nn.sigmoid(gates[:, 1 * H:2 * H])
            g = jnp.tanh(gates[:, 2 * H:3 * H])
            o = jax.nn.sigmoid(gates[:, 3 * H:4 * H])
            c = f * c + i * g
            h = o * jnp.tanh(c)
            hs.append(h)
        seq = jnp.stack(hs, axis=1)
    scores = jnp.mean(seq, axis=2)                     # (B, T)
    w = jax.nn.softmax(scores, axis=1)
    attn = jnp.einsum('bt,bth->bh', w, seq)
    return attn @ wfc.T + bfc


if __name__ == "__main__":
    # Small shapes consistent with the module's forward.
    B, T = 2, 8
    input_size, hidden_size, num_layers, output_size = 4, 32, 2, 4

    key = jax.random.PRNGKey(0)
    k_x, key = jax.random.split(key)
    x = jax.random.normal(k_x, (B, T, input_size), dtype=jnp.float32)

    # Deterministic parameter init, mimicking PyTorch U(-1/sqrt(H), 1/sqrt(H)).
    bound = 1.0 / jnp.sqrt(jnp.float32(hidden_size))
    layer_params = []
    for l in range(num_layers):
        d_in = input_size if l == 0 else hidden_size
        k1, k2, k3, k4, key = jax.random.split(key, 5)
        wih = jax.random.uniform(k1, (4 * hidden_size, d_in),
                                 minval=-bound, maxval=bound, dtype=jnp.float32)
        whh = jax.random.uniform(k2, (4 * hidden_size, hidden_size),
                                 minval=-bound, maxval=bound, dtype=jnp.float32)
        bih = jax.random.uniform(k3, (4 * hidden_size,),
                                 minval=-bound, maxval=bound, dtype=jnp.float32)
        bhh = jax.random.uniform(k4, (4 * hidden_size,),
                                 minval=-bound, maxval=bound, dtype=jnp.float32)
        layer_params.append((wih, whh, bih, bhh))
    k5, k6, key = jax.random.split(key, 3)
    wfc = jax.random.uniform(k5, (output_size, hidden_size),
                             minval=-bound, maxval=bound, dtype=jnp.float32)
    bfc = jax.random.uniform(k6, (output_size,),
                             minval=-bound, maxval=bound, dtype=jnp.float32)

    out = lstm_with_attention(x, layer_params, wfc, bfc)
    out = jax.block_until_ready(out)

    ref = jax.block_until_ready(ref_forward(x, layer_params, wfc, bfc))
    assert out.shape == (B, output_size)
    # bf16 matmul operands (f32 accumulate) -> loosened tolerance vs fp32 ref.
    assert jnp.allclose(out, ref, rtol=2e-2, atol=2e-2), (out, ref)

    print("KERNEL_OK")
</pallas_src>

<mosaic_0001>
module attributes {stable_mosaic.version = 11 : i64} {
  func.func @kernel(%arg0: memref<8x2x4xf32, #tpu.memory_space<vmem>>, %arg1: memref<4x128xbf16, #tpu.memory_space<vmem>>, %arg2: memref<32x128xbf16, #tpu.memory_space<vmem>>, %arg3: memref<1x128xf32, #tpu.memory_space<vmem>>, %arg4: memref<32x128xbf16, #tpu.memory_space<vmem>>, %arg5: memref<32x128xbf16, #tpu.memory_space<vmem>>, %arg6: memref<1x128xf32, #tpu.memory_space<vmem>>, %arg7: memref<32x4xbf16, #tpu.memory_space<vmem>>, %arg8: memref<1x4xf32, #tpu.memory_space<vmem>>, %arg9: memref<2x4xf32, #tpu.memory_space<vmem>>, %arg10: memref<8x2x32xf32, #tpu.memory_space<vmem>>, %arg11: memref<8x2x32xf32, #tpu.memory_space<vmem>>, %arg12: memref<8x2x128xf32, #tpu.memory_space<vmem>>) attributes {dimension_semantics = [], scalar_prefetch = 0 : i64, scratch_operands = 3 : i64, tpu.core_type = #tpu.core_type<tc>} {
    %0 = tpu.iota {dimensions = array<i32: 1>} : vector<2x128xi32>
    %c64_i32 = arith.constant 64 : i32
    %1 = vector.broadcast %c64_i32 : i32 to vector<2x128xi32>
    %2 = arith.cmpi sge, %0, %1 : vector<2x128xi32>
    %c96_i32 = arith.constant 96 : i32
    %3 = vector.broadcast %c96_i32 : i32 to vector<2x128xi32>
    %4 = arith.cmpi slt, %0, %3 : vector<2x128xi32>
    %5 = arith.andi %2, %4 : vector<2x128xi1>
    %c0 = arith.constant 0 : index
    %c0_0 = arith.constant 0 : index
    %6 = vector.load %arg1[%c0, %c0_0] : memref<4x128xbf16, #tpu.memory_space<vmem>>, vector<4x128xbf16>
    %c0_1 = arith.constant 0 : index
    %c0_2 = arith.constant 0 : index
    %7 = vector.load %arg2[%c0_1, %c0_2] : memref<32x128xbf16, #tpu.memory_space<vmem>>, vector<32x128xbf16>
    %c0_3 = arith.constant 0 : index
    %c0_4 = arith.constant 0 : index
    %8 = vector.load %arg3[%c0_3, %c0_4] : memref<1x128xf32, #tpu.memory_space<vmem>>, vector<1x128xf32>
    %c0_5 = arith.constant 0 : index
    %c0_6 = arith.constant 0 : index
    %c0_7 = arith.constant 0 : index
    %9 = vector.load %arg0[%c0_5, %c0_6, %c0_7] : memref<8x2x4xf32, #tpu.memory_space<vmem>>, vector<8x2x4xf32>
    %10 = vector.shape_cast %9 : vector<8x2x4xf32> to vector<16x4xf32>
    %11 = arith.truncf %10 : vector<16x4xf32> to vector<16x4xbf16>
    %cst = arith.constant dense<0.000000e+00> : vector<16x128xf32>
    %12 = tpu.matmul %11, %6, %cst {dimension_numbers = #tpu.dot_dimension_numbers<[1], [0], [0], [1], [0, 0, 1, 1], [], []>} : vector<16x4xbf16>, vector<4x128xbf16>, vector<16x128xf32> -> vector<16x128xf32>
    %13 = vector.broadcast %8 : vector<1x128xf32> to vector<16x128xf32>
    %14 = arith.addf %12, %13 : vector<16x128xf32>
    %15 = vector.shape_cast %14 : vector<16x128xf32> to vector<8x2x128xf32>
    %c0_8 = arith.constant 0 : index
    %c0_9 = arith.constant 0 : index
    %c0_10 = arith.constant 0 : index
    %16 = vector.load %arg12[%c0_8, %c0_9, %c0_10] : memref<8x2x128xf32, #tpu.memory_space<vmem>>, vector<8x2x128xf32>
    tpu.vector_store %arg12[%c0_8, %c0_9, %c0_10], %15 {strides = array<i32>} : memref<8x2x128xf32, #tpu.memory_space<vmem>>, vector<8x2x128xf32>,
    %cst_11 = arith.constant 0.000000e+00 : f32
    %17 = vector.broadcast %cst_11 : f32 to vector<2x32xf32>
    %cst_12 = arith.constant 0.000000e+00 : f32
    %18 = vector.broadcast %cst_12 : f32 to vector<2x32xf32>
    %c0_13 = arith.constant 0 : index
    %c0_14 = arith.constant 0 : index
    %c0_15 = arith.constant 0 : index
    %19 = vector.load %arg12[%c0_13, %c0_14, %c0_15] : memref<8x2x128xf32, #tpu.memory_space<vmem>>, vector<1x2x128xf32>
    %20 = vector.shape_cast %19 : vector<1x2x128xf32> to vector<2x128xf32>
    %21 = arith.truncf %17 : vector<2x32xf32> to vector<2x32xbf16>
    %cst_16 = arith.constant dense<0.000000e+00> : vector<2x128xf32>
    %22 = tpu.matmul %21, %7, %cst_16 {dimension_numbers = #tpu.dot_dimension_numbers<[1], [0], [0], [1], [0, 0, 1, 1], [], []>} : vector<2x32xbf16>, vector<32x128xbf16>, vector<2x128xf32> -> vector<2x128xf32>
    %23 = arith.addf %20, %22 : vector<2x128xf32>
    %24 = arith.negf %23 : vector<2x128xf32>
    %25 = math.exp %24 : vector<2x128xf32>
    %cst_17 = arith.constant 1.000000e+00 : f32
    %26 = vector.broadcast %cst_17 : f32 to vector<2x128xf32>
    %27 = arith.addf %26, %25 : vector<2x128xf32>
    %28 = arith.divf %26, %27 : vector<2x128xf32>
    %29 = math.tanh %23 : vector<2x128xf32>
    %30 = arith.select %5, %29, %28 : vector<2x128xi1>, vector<2x128xf32>
    %31 = vector.extract_strided_slice %30 {offsets = [0, 0], sizes = [2, 32], strides = [1, 1]} : vector<2x128xf32> to vector<2x32xf32>
    %32 = vector.extract_strided_slice %30 {offsets = [0, 32], sizes = [2, 32], strides = [1, 1]} : vector<2x128xf32> to vector<2x32xf32>
    %33 = vector.extract_strided_slice %30 {offsets = [0, 64], sizes = [2, 32], strides = [1, 1]} : vector<2x128xf32> to vector<2x32xf32>
    %34 = vector.extract_strided_slice %30 {offsets = [0, 96], sizes = [2, 32], strides = [1, 1]} : vector<2x128xf32> to vector<2x32xf32>
    %35 = arith.mulf %32, %18 : vector<2x32xf32>
    %36 = arith.mulf %31, %33 : vector<2x32xf32>
    %37 = arith.addf %35, %36 : vector<2x32xf32>
    %38 = math.tanh %37 : vector<2x32xf32>
    %39 = arith.mulf %34, %38 : vector<2x32xf32>
    %c0_18 = arith.constant 0 : index
    %c0_19 = arith.constant 0 : index
    %c0_20 = arith.constant 0 : index
    %40 = vector.load %arg10[%c0_18, %c0_19, %c0_20] : memref<8x2x32xf32, #tpu.memory_space<vmem>>, vector<1x2x32xf32>
    %41 = vector.shape_cast %40 : vector<1x2x32xf32> to vector<2x32xf32>
    %42 = vector.shape_cast %39 : vector<2x32xf32> to vector<1x2x32xf32>
    tpu.vector_store %arg10[%c0_18, %c0_19, %c0_20], %42 {strides = array<i32>} : memref<8x2x32xf32, #tpu.memory_space<vmem>>, vector<1x2x32xf32>,
    %c1 = arith.constant 1 : index
    %c0_21 = arith.constant 0 : index
    %c0_22 = arith.constant 0 : index
    %43 = vector.load %arg12[%c1, %c0_21, %c0_22] : memref<8x2x128xf32, #tpu.memory_space<vmem>>, vector<1x2x128xf32>
    %44 = vector.shape_cast %43 : vector<1x2x128xf32> to vector<2x128xf32>
    %45 = arith.truncf %39 : vector<2x32xf32> to vector<2x32xbf16>
    %cst_23 = arith.constant dense<0.000000e+00> : vector<2x128xf32>
    %46 = tpu.matmul %45, %7, %cst_23 {dimension_numbers = #tpu.dot_dimension_numbers<[1], [0], [0], [1], [0, 0, 1, 1], [], []>} : vector<2x32xbf16>, vector<32x128xbf16>, vector<2x128xf32> -> vector<2x128xf32>
    %47 = arith.addf %44, %46 : vector<2x128xf32>
    %48 = arith.negf %47 : vector<2x128xf32>
    %49 = math.exp %48 : vector<2x128xf32>
    %cst_24 = arith.constant 1.000000e+00 : f32
    %50 = vector.broadcast %cst_24 : f32 to vector<2x128xf32>
    %51 = arith.addf %50, %49 : vector<2x128xf32>
    %52 = arith.divf %50, %51 : vector<2x128xf32>
    %53 = math.tanh %47 : vector<2x128xf32>
    %54 = arith.select %5, %53, %52 : vector<2x128xi1>, vector<2x128xf32>
    %55 = vector.extract_strided_slice %54 {offsets = [0, 0], sizes = [2, 32], strides = [1, 1]} : vector<2x128xf32> to vector<2x32xf32>
    %56 = vector.extract_strided_slice %54 {offsets = [0, 32], sizes = [2, 32], strides = [1, 1]} : vector<2x128xf32> to vector<2x32xf32>
    %57 = vector.extract_strided_slice %54 {offsets = [0, 64], sizes = [2, 32], strides = [1, 1]} : vector<2x128xf32> to vector<2x32xf32>
    %58 = vector.extract_strided_slice %54 {offsets = [0, 96], sizes = [2, 32], strides = [1, 1]} : vector<2x128xf32> to vector<2x32xf32>
    %59 = arith.mulf %56, %37 : vector<2x32xf32>
    %60 = arith.mulf %55, %57 : vector<2x32xf32>
    %61 = arith.addf %59, %60 : vector<2x32xf32>
    %62 = math.tanh %61 : vector<2x32xf32>
    %63 = arith.mulf %58, %62 : vector<2x32xf32>
    %c1_25 = arith.constant 1 : index
    %c0_26 = arith.constant 0 : index
    %c0_27 = arith.constant 0 : index
    %64 = vector.load %arg10[%c1_25, %c0_26, %c0_27] : memref<8x2x32xf32, #tpu.memory_space<vmem>>, vector<1x2x32xf32>
    %65 = vector.shape_cast %64 : vector<1x2x32xf32> to vector<2x32xf32>
    %66 = vector.shape_cast %63 : vector<2x32xf32> to vector<1x2x32xf32>
    tpu.vector_store %arg10[%c1_25, %c0_26, %c0_27], %66 {strides = array<i32>} : memref<8x2x32xf32, #tpu.memory_space<vmem>>, vector<1x2x32xf32>,
    %c2 = arith.constant 2 : index
    %c0_28 = arith.constant 0 : index
    %c0_29 = arith.constant 0 : index
    %67 = vector.load %arg12[%c2, %c0_28, %c0_29] : memref<8x2x128xf32, #tpu.memory_space<vmem>>, vector<1x2x128xf32>
    %68 = vector.shape_cast %67 : vector<1x2x128xf32> to vector<2x128xf32>
    %69 = arith.truncf %63 : vector<2x32xf32> to vector<2x32xbf16>
    %cst_30 = arith.constant dense<0.000000e+00> : vector<2x128xf32>
    %70 = tpu.matmul %69, %7, %cst_30 {dimension_numbers = #tpu.dot_dimension_numbers<[1], [0], [0], [1], [0, 0, 1, 1], [], []>} : vector<2x32xbf16>, vector<32x128xbf16>, vector<2x128xf32> -> vector<2x128xf32>
    %71 = arith.addf %68, %70 : vector<2x128xf32>
    %72 = arith.negf %71 : vector<2x128xf32>
    %73 = math.exp %72 : vector<2x128xf32>
    %cst_31 = arith.constant 1.000000e+00 : f32
    %74 = vector.broadcast %cst_31 : f32 to vector<2x128xf32>
    %75 = arith.addf %74, %73 : vector<2x128xf32>
    %76 = arith.divf %74, %75 : vector<2x128xf32>
    %77 = math.tanh %71 : vector<2x128xf32>
    %78 = arith.select %5, %77, %76 : vector<2x128xi1>, vector<2x128xf32>
    %79 = vector.extract_strided_slice %78 {offsets = [0, 0], sizes = [2, 32], strides = [1, 1]} : vector<2x128xf32> to vector<2x32xf32>
    %80 = vector.extract_strided_slice %78 {offsets = [0, 32], sizes = [2, 32], strides = [1, 1]} : vector<2x128xf32> to vector<2x32xf32>
    %81 = vector.extract_strided_slice %78 {offsets = [0, 64], sizes = [2, 32], strides = [1, 1]} : vector<2x128xf32> to vector<2x32xf32>
    %82 = vector.extract_strided_slice %78 {offsets = [0, 96], sizes = [2, 32], strides = [1, 1]} : vector<2x128xf32> to vector<2x32xf32>
    %83 = arith.mulf %80, %61 : vector<2x32xf32>
    %84 = arith.mulf %79, %81 : vector<2x32xf32>
    %85 = arith.addf %83, %84 : vector<2x32xf32>
    %86 = math.tanh %85 : vector<2x32xf32>
    %87 = arith.mulf %82, %86 : vector<2x32xf32>
    %c2_32 = arith.constant 2 : index
    %c0_33 = arith.constant 0 : index
    %c0_34 = arith.constant 0 : index
    %88 = vector.load %arg10[%c2_32, %c0_33, %c0_34] : memref<8x2x32xf32, #tpu.memory_space<vmem>>, vector<1x2x32xf32>
    %89 = vector.shape_cast %88 : vector<1x2x32xf32> to vector<2x32xf32>
    %90 = vector.shape_cast %87 : vector<2x32xf32> to vector<1x2x32xf32>
    tpu.vector_store %arg10[%c2_32, %c0_33, %c0_34], %90 {strides = array<i32>} : memref<8x2x32xf32, #tpu.memory_space<vmem>>, vector<1x2x32xf32>,
    %c3 = arith.constant 3 : index
    %c0_35 = arith.constant 0 : index
    %c0_36 = arith.constant 0 : index
    %91 = vector.load %arg12[%c3, %c0_35, %c0_36] : memref<8x2x128xf32, #tpu.memory_space<vmem>>, vector<1x2x128xf32>
    %92 = vector.shape_cast %91 : vector<1x2x128xf32> to vector<2x128xf32>
    %93 = arith.truncf %87 : vector<2x32xf32> to vector<2x32xbf16>
    %cst_37 = arith.constant dense<0.000000e+00> : vector<2x128xf32>
    %94 = tpu.matmul %93, %7, %cst_37 {dimension_numbers = #tpu.dot_dimension_numbers<[1], [0], [0], [1], [0, 0, 1, 1], [], []>} : vector<2x32xbf16>, vector<32x128xbf16>, vector<2x128xf32> -> vector<2x128xf32>
    %95 = arith.addf %92, %94 : vector<2x128xf32>
    %96 = arith.negf %95 : vector<2x128xf32>
    %97 = math.exp %96 : vector<2x128xf32>
    %cst_38 = arith.constant 1.000000e+00 : f32
    %98 = vector.broadcast %cst_38 : f32 to vector<2x128xf32>
    %99 = arith.addf %98, %97 : vector<2x128xf32>
    %100 = arith.divf %98, %99 : vector<2x128xf32>
    %101 = math.tanh %95 : vector<2x128xf32>
    %102 = arith.select %5, %101, %100 : vector<2x128xi1>, vector<2x128xf32>
    %103 = vector.extract_strided_slice %102 {offsets = [0, 0], sizes = [2, 32], strides = [1, 1]} : vector<2x128xf32> to vector<2x32xf32>
    %104 = vector.extract_strided_slice %102 {offsets = [0, 32], sizes = [2, 32], strides = [1, 1]} : vector<2x128xf32> to vector<2x32xf32>
    %105 = vector.extract_strided_slice %102 {offsets = [0, 64], sizes = [2, 32], strides = [1, 1]} : vector<2x128xf32> to vector<2x32xf32>
    %106 = vector.extract_strided_slice %102 {offsets = [0, 96], sizes = [2, 32], strides = [1, 1]} : vector<2x128xf32> to vector<2x32xf32>
    %107 = arith.mulf %104, %85 : vector<2x32xf32>
    %108 = arith.mulf %103, %105 : vector<2x32xf32>
    %109 = arith.addf %107, %108 : vector<2x32xf32>
    %110 = math.tanh %109 : vector<2x32xf32>
    %111 = arith.mulf %106, %110 : vector<2x32xf32>
    %c3_39 = arith.constant 3 : index
    %c0_40 = arith.constant 0 : index
    %c0_41 = arith.constant 0 : index
    %112 = vector.load %arg10[%c3_39, %c0_40, %c0_41] : memref<8x2x32xf32, #tpu.memory_space<vmem>>, vector<1x2x32xf32>
    %113 = vector.shape_cast %112 : vector<1x2x32xf32> to vector<2x32xf32>
    %114 = vector.shape_cast %111 : vector<2x32xf32> to vector<1x2x32xf32>
    tpu.vector_store %arg10[%c3_39, %c0_40, %c0_41], %114 {strides = array<i32>} : memref<8x2x32xf32, #tpu.memory_space<vmem>>, vector<1x2x32xf32>,
    %c4 = arith.constant 4 : index
    %c0_42 = arith.constant 0 : index
    %c0_43 = arith.constant 0 : index
    %115 = vector.load %arg12[%c4, %c0_42, %c0_43] : memref<8x2x128xf32, #tpu.memory_space<vmem>>, vector<1x2x128xf32>
    %116 = vector.shape_cast %115 : vector<1x2x128xf32> to vector<2x128xf32>
    %117 = arith.truncf %111 : vector<2x32xf32> to vector<2x32xbf16>
    %cst_44 = arith.constant dense<0.000000e+00> : vector<2x128xf32>
    %118 = tpu.matmul %117, %7, %cst_44 {dimension_numbers = #tpu.dot_dimension_numbers<[1], [0], [0], [1], [0, 0, 1, 1], [], []>} : vector<2x32xbf16>, vector<32x128xbf16>, vector<2x128xf32> -> vector<2x128xf32>
    %119 = arith.addf %116, %118 : vector<2x128xf32>
    %120 = arith.negf %119 : vector<2x128xf32>
    %121 = math.exp %120 : vector<2x128xf32>
    %cst_45 = arith.constant 1.000000e+00 : f32
    %122 = vector.broadcast %cst_45 : f32 to vector<2x128xf32>
    %123 = arith.addf %122, %121 : vector<2x128xf32>
    %124 = arith.divf %122, %123 : vector<2x128xf32>
    %125 = math.tanh %119 : vector<2x128xf32>
    %126 = arith.select %5, %125, %124 : vector<2x128xi1>, vector<2x128xf32>
    %127 = vector.extract_strided_slice %126 {offsets = [0, 0], sizes = [2, 32], strides = [1, 1]} : vector<2x128xf32> to vector<2x32xf32>
    %128 = vector.extract_strided_slice %126 {offsets = [0, 32], sizes = [2, 32], strides = [1, 1]} : vector<2x128xf32> to vector<2x32xf32>
    %129 = vector.extract_strided_slice %126 {offsets = [0, 64], sizes = [2, 32], strides = [1, 1]} : vector<2x128xf32> to vector<2x32xf32>
    %130 = vector.extract_strided_slice %126 {offsets = [0, 96], sizes = [2, 32], strides = [1, 1]} : vector<2x128xf32> to vector<2x32xf32>
    %131 = arith.mulf %128, %109 : vector<2x32xf32>
    %132 = arith.mulf %127, %129 : vector<2x32xf32>
    %133 = arith.addf %131, %132 : vector<2x32xf32>
    %134 = math.tanh %133 : vector<2x32xf32>
    %135 = arith.mulf %130, %134 : vector<2x32xf32>
    %c4_46 = arith.constant 4 : index
    %c0_47 = arith.constant 0 : index
    %c0_48 = arith.constant 0 : index
    %136 = vector.load %arg10[%c4_46, %c0_47, %c0_48] : memref<8x2x32xf32, #tpu.memory_space<vmem>>, vector<1x2x32xf32>
    %137 = vector.shape_cast %136 : vector<1x2x32xf32> to vector<2x32xf32>
    %138 = vector.shape_cast %135 : vector<2x32xf32> to vector<1x2x32xf32>
    tpu.vector_store %arg10[%c4_46, %c0_47, %c0_48], %138 {strides = array<i32>} : memref<8x2x32xf32, #tpu.memory_space<vmem>>, vector<1x2x32xf32>,
    %c5 = arith.constant 5 : index
    %c0_49 = arith.constant 0 : index
    %c0_50 = arith.constant 0 : index
    %139 = vector.load %arg12[%c5, %c0_49, %c0_50] : memref<8x2x128xf32, #tpu.memory_space<vmem>>, vector<1x2x128xf32>
    %140 = vector.shape_cast %139 : vector<1x2x128xf32> to vector<2x128xf32>
    %141 = arith.truncf %135 : vector<2x32xf32> to vector<2x32xbf16>
    %cst_51 = arith.constant dense<0.000000e+00> : vector<2x128xf32>
    %142 = tpu.matmul %141, %7, %cst_51 {dimension_numbers = #tpu.dot_dimension_numbers<[1], [0], [0], [1], [0, 0, 1, 1], [], []>} : vector<2x32xbf16>, vector<32x128xbf16>, vector<2x128xf32> -> vector<2x128xf32>
    %143 = arith.addf %140, %142 : vector<2x128xf32>
    %144 = arith.negf %143 : vector<2x128xf32>
    %145 = math.exp %144 : vector<2x128xf32>
    %cst_52 = arith.constant 1.000000e+00 : f32
    %146 = vector.broadcast %cst_52 : f32 to vector<2x128xf32>
    %147 = arith.addf %146, %145 : vector<2x128xf32>
    %148 = arith.divf %146, %147 : vector<2x128xf32>
    %149 = math.tanh %143 : vector<2x128xf32>
    %150 = arith.select %5, %149, %148 : vector<2x128xi1>, vector<2x128xf32>
    %151 = vector.extract_strided_slice %150 {offsets = [0, 0], sizes = [2, 32], strides = [1, 1]} : vector<2x128xf32> to vector<2x32xf32>
    %152 = vector.extract_strided_slice %150 {offsets = [0, 32], sizes = [2, 32], strides = [1, 1]} : vector<2x128xf32> to vector<2x32xf32>
    %153 = vector.extract_strided_slice %150 {offsets = [0, 64], sizes = [2, 32], strides = [1, 1]} : vector<2x128xf32> to vector<2x32xf32>
    %154 = vector.extract_strided_slice %150 {offsets = [0, 96], sizes = [2, 32], strides = [1, 1]} : vector<2x128xf32> to vector<2x32xf32>
    %155 = arith.mulf %152, %133 : vector<2x32xf32>
    %156 = arith.mulf %151, %153 : vector<2x32xf32>
    %157 = arith.addf %155, %156 : vector<2x32xf32>
    %158 = math.tanh %157 : vector<2x32xf32>
    %159 = arith.mulf %154, %158 : vector<2x32xf32>
    %c5_53 = arith.constant 5 : index
    %c0_54 = arith.constant 0 : index
    %c0_55 = arith.constant 0 : index
    %160 = vector.load %arg10[%c5_53, %c0_54, %c0_55] : memref<8x2x32xf32, #tpu.memory_space<vmem>>, vector<1x2x32xf32>
    %161 = vector.shape_cast %160 : vector<1x2x32xf32> to vector<2x32xf32>
    %162 = vector.shape_cast %159 : vector<2x32xf32> to vector<1x2x32xf32>
    tpu.vector_store %arg10[%c5_53, %c0_54, %c0_55], %162 {strides = array<i32>} : memref<8x2x32xf32, #tpu.memory_space<vmem>>, vector<1x2x32xf32>,
    %c6 = arith.constant 6 : index
    %c0_56 = arith.constant 0 : index
    %c0_57 = arith.constant 0 : index
    %163 = vector.load %arg12[%c6, %c0_56, %c0_57] : memref<8x2x128xf32, #tpu.memory_space<vmem>>, vector<1x2x128xf32>
    %164 = vector.shape_cast %163 : vector<1x2x128xf32> to vector<2x128xf32>
    %165 = arith.truncf %159 : vector<2x32xf32> to vector<2x32xbf16>
    %cst_58 = arith.constant dense<0.000000e+00> : vector<2x128xf32>
    %166 = tpu.matmul %165, %7, %cst_58 {dimension_numbers = #tpu.dot_dimension_numbers<[1], [0], [0], [1], [0, 0, 1, 1], [], []>} : vector<2x32xbf16>, vector<32x128xbf16>, vector<2x128xf32> -> vector<2x128xf32>
    %167 = arith.addf %164, %166 : vector<2x128xf32>
    %168 = arith.negf %167 : vector<2x128xf32>
    %169 = math.exp %168 : vector<2x128xf32>
    %cst_59 = arith.constant 1.000000e+00 : f32
    %170 = vector.broadcast %cst_59 : f32 to vector<2x128xf32>
    %171 = arith.addf %170, %169 : vector<2x128xf32>
    %172 = arith.divf %170, %171 : vector<2x128xf32>
    %173 = math.tanh %167 : vector<2x128xf32>
    %174 = arith.select %5, %173, %172 : vector<2x128xi1>, vector<2x128xf32>
    %175 = vector.extract_strided_slice %174 {offsets = [0, 0], sizes = [2, 32], strides = [1, 1]} : vector<2x128xf32> to vector<2x32xf32>
    %176 = vector.extract_strided_slice %174 {offsets = [0, 32], sizes = [2, 32], strides = [1, 1]} : vector<2x128xf32> to vector<2x32xf32>
    %177 = vector.extract_strided_slice %174 {offsets = [0, 64], sizes = [2, 32], strides = [1, 1]} : vector<2x128xf32> to vector<2x32xf32>
    %178 = vector.extract_strided_slice %174 {offsets = [0, 96], sizes = [2, 32], strides = [1, 1]} : vector<2x128xf32> to vector<2x32xf32>
    %179 = arith.mulf %176, %157 : vector<2x32xf32>
    %180 = arith.mulf %175, %177 : vector<2x32xf32>
    %181 = arith.addf %179, %180 : vector<2x32xf32>
    %182 = math.tanh %181 : vector<2x32xf32>
    %183 = arith.mulf %178, %182 : vector<2x32xf32>
    %c6_60 = arith.constant 6 : index
    %c0_61 = arith.constant 0 : index
    %c0_62 = arith.constant 0 : index
    %184 = vector.load %arg10[%c6_60, %c0_61, %c0_62] : memref<8x2x32xf32, #tpu.memory_space<vmem>>, vector<1x2x32xf32>
    %185 = vector.shape_cast %184 : vector<1x2x32xf32> to vector<2x32xf32>
    %186 = vector.shape_cast %183 : vector<2x32xf32> to vector<1x2x32xf32>
    tpu.vector_store %arg10[%c6_60, %c0_61, %c0_62], %186 {strides = array<i32>} : memref<8x2x32xf32, #tpu.memory_space<vmem>>, vector<1x2x32xf32>,
    %c7 = arith.constant 7 : index
    %c0_63 = arith.constant 0 : index
    %c0_64 = arith.constant 0 : index
    %187 = vector.load %arg12[%c7, %c0_63, %c0_64] : memref<8x2x128xf32, #tpu.memory_space<vmem>>, vector<1x2x128xf32>
    %188 = vector.shape_cast %187 : vector<1x2x128xf32> to vector<2x128xf32>
    %189 = arith.truncf %183 : vector<2x32xf32> to vector<2x32xbf16>
    %cst_65 = arith.constant dense<0.000000e+00> : vector<2x128xf32>
    %190 = tpu.matmul %189, %7, %cst_65 {dimension_numbers = #tpu.dot_dimension_numbers<[1], [0], [0], [1], [0, 0, 1, 1], [], []>} : vector<2x32xbf16>, vector<32x128xbf16>, vector<2x128xf32> -> vector<2x128xf32>
    %191 = arith.addf %188, %190 : vector<2x128xf32>
    %192 = arith.negf %191 : vector<2x128xf32>
    %193 = math.exp %192 : vector<2x128xf32>
    %cst_66 = arith.constant 1.000000e+00 : f32
    %194 = vector.broadcast %cst_66 : f32 to vector<2x128xf32>
    %195 = arith.addf %194, %193 : vector<2x128xf32>
    %196 = arith.divf %194, %195 : vector<2x128xf32>
    %197 = math.tanh %191 : vector<2x128xf32>
    %198 = arith.select %5, %197, %196 : vector<2x128xi1>, vector<2x128xf32>
    %199 = vector.extract_strided_slice %198 {offsets = [0, 0], sizes = [2, 32], strides = [1, 1]} : vector<2x128xf32> to vector<2x32xf32>
    %200 = vector.extract_strided_slice %198 {offsets = [0, 32], sizes = [2, 32], strides = [1, 1]} : vector<2x128xf32> to vector<2x32xf32>
    %201 = vector.extract_strided_slice %198 {offsets = [0, 64], sizes = [2, 32], strides = [1, 1]} : vector<2x128xf32> to vector<2x32xf32>
    %202 = vector.extract_strided_slice %198 {offsets = [0, 96], sizes = [2, 32], strides = [1, 1]} : vector<2x128xf32> to vector<2x32xf32>
    %203 = arith.mulf %200, %181 : vector<2x32xf32>
    %204 = arith.mulf %199, %201 : vector<2x32xf32>
    %205 = arith.addf %203, %204 : vector<2x32xf32>
    %206 = math.tanh %205 : vector<2x32xf32>
    %207 = arith.mulf %202, %206 : vector<2x32xf32>
    %c7_67 = arith.constant 7 : index
    %c0_68 = arith.constant 0 : index
    %c0_69 = arith.constant 0 : index
    %208 = vector.load %arg10[%c7_67, %c0_68, %c0_69] : memref<8x2x32xf32, #tpu.memory_space<vmem>>, vector<1x2x32xf32>
    %209 = vector.shape_cast %208 : vector<1x2x32xf32> to vector<2x32xf32>
    %210 = vector.shape_cast %207 : vector<2x32xf32> to vector<1x2x32xf32>
    tpu.vector_store %arg10[%c7_67, %c0_68, %c0_69], %210 {strides = array<i32>} : memref<8x2x32xf32, #tpu.memory_space<vmem>>, vector<1x2x32xf32>,
    %c0_70 = arith.constant 0 : index
    %c0_71 = arith.constant 0 : index
    %211 = vector.load %arg4[%c0_70, %c0_71] : memref<32x128xbf16, #tpu.memory_space<vmem>>, vector<32x128xbf16>
    %c0_72 = arith.constant 0 : index
    %c0_73 = arith.constant 0 : index
    %212 = vector.load %arg5[%c0_72, %c0_73] : memref<32x128xbf16, #tpu.memory_space<vmem>>, vector<32x128xbf16>
    %c0_74 = arith.constant 0 : index
    %c0_75 = arith.constant 0 : index
    %213 = vector.load %arg6[%c0_74, %c0_75] : memref<1x128xf32, #tpu.memory_space<vmem>>, vector<1x128xf32>
    %c0_76 = arith.constant 0 : index
    %c0_77 = arith.constant 0 : index
    %c0_78 = arith.constant 0 : index
    %214 = vector.load %arg10[%c0_76, %c0_77, %c0_78] : memref<8x2x32xf32, #tpu.memory_space<vmem>>, vector<8x2x32xf32>
    %215 = vector.shape_cast %214 : vector<8x2x32xf32> to vector<16x32xf32>
    %216 = arith.truncf %215 : vector<16x32xf32> to vector<16x32xbf16>
    %cst_79 = arith.constant dense<0.000000e+00> : vector<16x128xf32>
    %217 = tpu.matmul %216, %211, %cst_79 {dimension_numbers = #tpu.dot_dimension_numbers<[1], [0], [0], [1], [0, 0, 1, 1], [], []>} : vector<16x32xbf16>, vector<32x128xbf16>, vector<16x128xf32> -> vector<16x128xf32>
    %218 = vector.broadcast %213 : vector<1x128xf32> to vector<16x128xf32>
    %219 = arith.addf %217, %218 : vector<16x128xf32>
    %220 = vector.shape_cast %219 : vector<16x128xf32> to vector<8x2x128xf32>
    %c0_80 = arith.constant 0 : index
    %c0_81 = arith.constant 0 : index
    %c0_82 = arith.constant 0 : index
    %221 = vector.load %arg12[%c0_80, %c0_81, %c0_82] : memref<8x2x128xf32, #tpu.memory_space<vmem>>, vector<8x2x128xf32>
    tpu.vector_store %arg12[%c0_80, %c0_81, %c0_82], %220 {strides = array<i32>} : memref<8x2x128xf32, #tpu.memory_space<vmem>>, vector<8x2x128xf32>,
    %cst_83 = arith.constant 0.000000e+00 : f32
    %222 = vector.broadcast %cst_83 : f32 to vector<2x32xf32>
    %cst_84 = arith.constant 0.000000e+00 : f32
    %223 = vector.broadcast %cst_84 : f32 to vector<2x32xf32>
    %c0_85 = arith.constant 0 : index
    %c0_86 = arith.constant 0 : index
    %c0_87 = arith.constant 0 : index
    %224 = vector.load %arg12[%c0_85, %c0_86, %c0_87] : memref<8x2x128xf32, #tpu.memory_space<vmem>>, vector<1x2x128xf32>
    %225 = vector.shape_cast %224 : vector<1x2x128xf32> to vector<2x128xf32>
    %226 = arith.truncf %222 : vector<2x32xf32> to vector<2x32xbf16>
    %cst_88 = arith.constant dense<0.000000e+00> : vector<2x128xf32>
    %227 = tpu.matmul %226, %212, %cst_88 {dimension_numbers = #tpu.dot_dimension_numbers<[1], [0], [0], [1], [0, 0, 1, 1], [], []>} : vector<2x32xbf16>, vector<32x128xbf16>, vector<2x128xf32> -> vector<2x128xf32>
    %228 = arith.addf %225, %227 : vector<2x128xf32>
    %229 = arith.negf %228 : vector<2x128xf32>
    %230 = math.exp %229 : vector<2x128xf32>
    %cst_89 = arith.constant 1.000000e+00 : f32
    %231 = vector.broadcast %cst_89 : f32 to vector<2x128xf32>
    %232 = arith.addf %231, %230 : vector<2x128xf32>
    %233 = arith.divf %231, %232 : vector<2x128xf32>
    %234 = math.tanh %228 : vector<2x128xf32>
    %235 = arith.select %5, %234, %233 : vector<2x128xi1>, vector<2x128xf32>
    %236 = vector.extract_strided_slice %235 {offsets = [0, 0], sizes = [2, 32], strides = [1, 1]} : vector<2x128xf32> to vector<2x32xf32>
    %237 = vector.extract_strided_slice %235 {offsets = [0, 32], sizes = [2, 32], strides = [1, 1]} : vector<2x128xf32> to vector<2x32xf32>
    %238 = vector.extract_strided_slice %235 {offsets = [0, 64], sizes = [2, 32], strides = [1, 1]} : vector<2x128xf32> to vector<2x32xf32>
    %239 = vector.extract_strided_slice %235 {offsets = [0, 96], sizes = [2, 32], strides = [1, 1]} : vector<2x128xf32> to vector<2x32xf32>
    %240 = arith.mulf %237, %223 : vector<2x32xf32>
    %241 = arith.mulf %236, %238 : vector<2x32xf32>
    %242 = arith.addf %240, %241 : vector<2x32xf32>
    %243 = math.tanh %242 : vector<2x32xf32>
    %244 = arith.mulf %239, %243 : vector<2x32xf32>
    %c0_90 = arith.constant 0 : index
    %c0_91 = arith.constant 0 : index
    %c0_92 = arith.constant 0 : index
    %245 = vector.load %arg11[%c0_90, %c0_91, %c0_92] : memref<8x2x32xf32, #tpu.memory_space<vmem>>, vector<1x2x32xf32>
    %246 = vector.shape_cast %245 : vector<1x2x32xf32> to vector<2x32xf32>
    %247 = vector.shape_cast %244 : vector<2x32xf32> to vector<1x2x32xf32>
    tpu.vector_store %arg11[%c0_90, %c0_91, %c0_92], %247 {strides = array<i32>} : memref<8x2x32xf32, #tpu.memory_space<vmem>>, vector<1x2x32xf32>,
    %c1_93 = arith.constant 1 : index
    %c0_94 = arith.constant 0 : index
    %c0_95 = arith.constant 0 : index
    %248 = vector.load %arg12[%c1_93, %c0_94, %c0_95] : memref<8x2x128xf32, #tpu.memory_space<vmem>>, vector<1x2x128xf32>
    %249 = vector.shape_cast %248 : vector<1x2x128xf32> to vector<2x128xf32>
    %250 = arith.truncf %244 : vector<2x32xf32> to vector<2x32xbf16>
    %cst_96 = arith.constant dense<0.000000e+00> : vector<2x128xf32>
    %251 = tpu.matmul %250, %212, %cst_96 {dimension_numbers = #tpu.dot_dimension_numbers<[1], [0], [0], [1], [0, 0, 1, 1], [], []>} : vector<2x32xbf16>, vector<32x128xbf16>, vector<2x128xf32> -> vector<2x128xf32>
    %252 = arith.addf %249, %251 : vector<2x128xf32>
    %253 = arith.negf %252 : vector<2x128xf32>
    %254 = math.exp %253 : vector<2x128xf32>
    %cst_97 = arith.constant 1.000000e+00 : f32
    %255 = vector.broadcast %cst_97 : f32 to vector<2x128xf32>
    %256 = arith.addf %255, %254 : vector<2x128xf32>
    %257 = arith.divf %255, %256 : vector<2x128xf32>
    %258 = math.tanh %252 : vector<2x128xf32>
    %259 = arith.select %5, %258, %257 : vector<2x128xi1>, vector<2x128xf32>
    %260 = vector.extract_strided_slice %259 {offsets = [0, 0], sizes = [2, 32], strides = [1, 1]} : vector<2x128xf32> to vector<2x32xf32>
    %261 = vector.extract_strided_slice %259 {offsets = [0, 32], sizes = [2, 32], strides = [1, 1]} : vector<2x128xf32> to vector<2x32xf32>
    %262 = vector.extract_strided_slice %259 {offsets = [0, 64], sizes = [2, 32], strides = [1, 1]} : vector<2x128xf32> to vector<2x32xf32>
    %263 = vector.extract_strided_slice %259 {offsets = [0, 96], sizes = [2, 32], strides = [1, 1]} : vector<2x128xf32> to vector<2x32xf32>
    %264 = arith.mulf %261, %242 : vector<2x32xf32>
    %265 = arith.mulf %260, %262 : vector<2x32xf32>
    %266 = arith.addf %264, %265 : vector<2x32xf32>
    %267 = math.tanh %266 : vector<2x32xf32>
    %268 = arith.mulf %263, %267 : vector<2x32xf32>
    %c1_98 = arith.constant 1 : index
    %c0_99 = arith.constant 0 : index
    %c0_100 = arith.constant 0 : index
    %269 = vector.load %arg11[%c1_98, %c0_99, %c0_100] : memref<8x2x32xf32, #tpu.memory_space<vmem>>, vector<1x2x32xf32>
    %270 = vector.shape_cast %269 : vector<1x2x32xf32> to vector<2x32xf32>
    %271 = vector.shape_cast %268 : vector<2x32xf32> to vector<1x2x32xf32>
    tpu.vector_store %arg11[%c1_98, %c0_99, %c0_100], %271 {strides = array<i32>} : memref<8x2x32xf32, #tpu.memory_space<vmem>>, vector<1x2x32xf32>,
    %c2_101 = arith.constant 2 : index
    %c0_102 = arith.constant 0 : index
    %c0_103 = arith.constant 0 : index
    %272 = vector.load %arg12[%c2_101, %c0_102, %c0_103] : memref<8x2x128xf32, #tpu.memory_space<vmem>>, vector<1x2x128xf32>
    %273 = vector.shape_cast %272 : vector<1x2x128xf32> to vector<2x128xf32>
    %274 = arith.truncf %268 : vector<2x32xf32> to vector<2x32xbf16>
    %cst_104 = arith.constant dense<0.000000e+00> : vector<2x128xf32>
    %275 = tpu.matmul %274, %212, %cst_104 {dimension_numbers = #tpu.dot_dimension_numbers<[1], [0], [0], [1], [0, 0, 1, 1], [], []>} : vector<2x32xbf16>, vector<32x128xbf16>, vector<2x128xf32> -> vector<2x128xf32>
    %276 = arith.addf %273, %275 : vector<2x128xf32>
    %277 = arith.negf %276 : vector<2x128xf32>
    %278 = math.exp %277 : vector<2x128xf32>
    %cst_105 = arith.constant 1.000000e+00 : f32
    %279 = vector.broadcast %cst_105 : f32 to vector<2x128xf32>
    %280 = arith.addf %279, %278 : vector<2x128xf32>
    %281 = arith.divf %279, %280 : vector<2x128xf32>
    %282 = math.tanh %276 : vector<2x128xf32>
    %283 = arith.select %5, %282, %281 : vector<2x128xi1>, vector<2x128xf32>
    %284 = vector.extract_strided_slice %283 {offsets = [0, 0], sizes = [2, 32], strides = [1, 1]} : vector<2x128xf32> to vector<2x32xf32>
    %285 = vector.extract_strided_slice %283 {offsets = [0, 32], sizes = [2, 32], strides = [1, 1]} : vector<2x128xf32> to vector<2x32xf32>
    %286 = vector.extract_strided_slice %283 {offsets = [0, 64], sizes = [2, 32], strides = [1, 1]} : vector<2x128xf32> to vector<2x32xf32>
    %287 = vector.extract_strided_slice %283 {offsets = [0, 96], sizes = [2, 32], strides = [1, 1]} : vector<2x128xf32> to vector<2x32xf32>
    %288 = arith.mulf %285, %266 : vector<2x32xf32>
    %289 = arith.mulf %284, %286 : vector<2x32xf32>
    %290 = arith.addf %288, %289 : vector<2x32xf32>
    %291 = math.tanh %290 : vector<2x32xf32>
    %292 = arith.mulf %287, %291 : vector<2x32xf32>
    %c2_106 = arith.constant 2 : index
    %c0_107 = arith.constant 0 : index
    %c0_108 = arith.constant 0 : index
    %293 = vector.load %arg11[%c2_106, %c0_107, %c0_108] : memref<8x2x32xf32, #tpu.memory_space<vmem>>, vector<1x2x32xf32>
    %294 = vector.shape_cast %293 : vector<1x2x32xf32> to vector<2x32xf32>
    %295 = vector.shape_cast %292 : vector<2x32xf32> to vector<1x2x32xf32>
    tpu.vector_store %arg11[%c2_106, %c0_107, %c0_108], %295 {strides = array<i32>} : memref<8x2x32xf32, #tpu.memory_space<vmem>>, vector<1x2x32xf32>,
    %c3_109 = arith.constant 3 : index
    %c0_110 = arith.constant 0 : index
    %c0_111 = arith.constant 0 : index
    %296 = vector.load %arg12[%c3_109, %c0_110, %c0_111] : memref<8x2x128xf32, #tpu.memory_space<vmem>>, vector<1x2x128xf32>
    %297 = vector.shape_cast %296 : vector<1x2x128xf32> to vector<2x128xf32>
    %298 = arith.truncf %292 : vector<2x32xf32> to vector<2x32xbf16>
    %cst_112 = arith.constant dense<0.000000e+00> : vector<2x128xf32>
    %299 = tpu.matmul %298, %212, %cst_112 {dimension_numbers = #tpu.dot_dimension_numbers<[1], [0], [0], [1], [0, 0, 1, 1], [], []>} : vector<2x32xbf16>, vector<32x128xbf16>, vector<2x128xf32> -> vector<2x128xf32>
    %300 = arith.addf %297, %299 : vector<2x128xf32>
    %301 = arith.negf %300 : vector<2x128xf32>
    %302 = math.exp %301 : vector<2x128xf32>
    %cst_113 = arith.constant 1.000000e+00 : f32
    %303 = vector.broadcast %cst_113 : f32 to vector<2x128xf32>
    %304 = arith.addf %303, %302 : vector<2x128xf32>
    %305 = arith.divf %303, %304 : vector<2x128xf32>
    %306 = math.tanh %300 : vector<2x128xf32>
    %307 = arith.select %5, %306, %305 : vector<2x128xi1>, vector<2x128xf32>
    %308 = vector.extract_strided_slice %307 {offsets = [0, 0], sizes = [2, 32], strides = [1, 1]} : vector<2x128xf32> to vector<2x32xf32>
    %309 = vector.extract_strided_slice %307 {offsets = [0, 32], sizes = [2, 32], strides = [1, 1]} : vector<2x128xf32> to vector<2x32xf32>
    %310 = vector.extract_strided_slice %307 {offsets = [0, 64], sizes = [2, 32], strides = [1, 1]} : vector<2x128xf32> to vector<2x32xf32>
    %311 = vector.extract_strided_slice %307 {offsets = [0, 96], sizes = [2, 32], strides = [1, 1]} : vector<2x128xf32> to vector<2x32xf32>
    %312 = arith.mulf %309, %290 : vector<2x32xf32>
    %313 = arith.mulf %308, %310 : vector<2x32xf32>
    %314 = arith.addf %312, %313 : vector<2x32xf32>
    %315 = math.tanh %314 : vector<2x32xf32>
    %316 = arith.mulf %311, %315 : vector<2x32xf32>
    %c3_114 = arith.constant 3 : index
    %c0_115 = arith.constant 0 : index
    %c0_116 = arith.constant 0 : index
    %317 = vector.load %arg11[%c3_114, %c0_115, %c0_116] : memref<8x2x32xf32, #tpu.memory_space<vmem>>, vector<1x2x32xf32>
    %318 = vector.shape_cast %317 : vector<1x2x32xf32> to vector<2x32xf32>
    %319 = vector.shape_cast %316 : vector<2x32xf32> to vector<1x2x32xf32>
    tpu.vector_store %arg11[%c3_114, %c0_115, %c0_116], %319 {strides = array<i32>} : memref<8x2x32xf32, #tpu.memory_space<vmem>>, vector<1x2x32xf32>,
    %c4_117 = arith.constant 4 : index
    %c0_118 = arith.constant 0 : index
    %c0_119 = arith.constant 0 : index
    %320 = vector.load %arg12[%c4_117, %c0_118, %c0_119] : memref<8x2x128xf32, #tpu.memory_space<vmem>>, vector<1x2x128xf32>
    %321 = vector.shape_cast %320 : vector<1x2x128xf32> to vector<2x128xf32>
    %322 = arith.truncf %316 : vector<2x32xf32> to vector<2x32xbf16>
    %cst_120 = arith.constant dense<0.000000e+00> : vector<2x128xf32>
    %323 = tpu.matmul %322, %212, %cst_120 {dimension_numbers = #tpu.dot_dimension_numbers<[1], [0], [0], [1], [0, 0, 1, 1], [], []>} : vector<2x32xbf16>, vector<32x128xbf16>, vector<2x128xf32> -> vector<2x128xf32>
    %324 = arith.addf %321, %323 : vector<2x128xf32>
    %325 = arith.negf %324 : vector<2x128xf32>
    %326 = math.exp %325 : vector<2x128xf32>
    %cst_121 = arith.constant 1.000000e+00 : f32
    %327 = vector.broadcast %cst_121 : f32 to vector<2x128xf32>
    %328 = arith.addf %327, %326 : vector<2x128xf32>
    %329 = arith.divf %327, %328 : vector<2x128xf32>
    %330 = math.tanh %324 : vector<2x128xf32>
    %331 = arith.select %5, %330, %329 : vector<2x128xi1>, vector<2x128xf32>
    %332 = vector.extract_strided_slice %331 {offsets = [0, 0], sizes = [2, 32], strides = [1, 1]} : vector<2x128xf32> to vector<2x32xf32>
    %333 = vector.extract_strided_slice %331 {offsets = [0, 32], sizes = [2, 32], strides = [1, 1]} : vector<2x128xf32> to vector<2x32xf32>
    %334 = vector.extract_strided_slice %331 {offsets = [0, 64], sizes = [2, 32], strides = [1, 1]} : vector<2x128xf32> to vector<2x32xf32>
    %335 = vector.extract_strided_slice %331 {offsets = [0, 96], sizes = [2, 32], strides = [1, 1]} : vector<2x128xf32> to vector<2x32xf32>
    %336 = arith.mulf %333, %314 : vector<2x32xf32>
    %337 = arith.mulf %332, %334 : vector<2x32xf32>
    %338 = arith.addf %336, %337 : vector<2x32xf32>
    %339 = math.tanh %338 : vector<2x32xf32>
    %340 = arith.mulf %335, %339 : vector<2x32xf32>
    %c4_122 = arith.constant 4 : index
    %c0_123 = arith.constant 0 : index
    %c0_124 = arith.constant 0 : index
    %341 = vector.load %arg11[%c4_122, %c0_123, %c0_124] : memref<8x2x32xf32, #tpu.memory_space<vmem>>, vector<1x2x32xf32>
    %342 = vector.shape_cast %341 : vector<1x2x32xf32> to vector<2x32xf32>
    %343 = vector.shape_cast %340 : vector<2x32xf32> to vector<1x2x32xf32>
    tpu.vector_store %arg11[%c4_122, %c0_123, %c0_124], %343 {strides = array<i32>} : memref<8x2x32xf32, #tpu.memory_space<vmem>>, vector<1x2x32xf32>,
    %c5_125 = arith.constant 5 : index
    %c0_126 = arith.constant 0 : index
    %c0_127 = arith.constant 0 : index
    %344 = vector.load %arg12[%c5_125, %c0_126, %c0_127] : memref<8x2x128xf32, #tpu.memory_space<vmem>>, vector<1x2x128xf32>
    %345 = vector.shape_cast %344 : vector<1x2x128xf32> to vector<2x128xf32>
    %346 = arith.truncf %340 : vector<2x32xf32> to vector<2x32xbf16>
    %cst_128 = arith.constant dense<0.000000e+00> : vector<2x128xf32>
    %347 = tpu.matmul %346, %212, %cst_128 {dimension_numbers = #tpu.dot_dimension_numbers<[1], [0], [0], [1], [0, 0, 1, 1], [], []>} : vector<2x32xbf16>, vector<32x128xbf16>, vector<2x128xf32> -> vector<2x128xf32>
    %348 = arith.addf %345, %347 : vector<2x128xf32>
    %349 = arith.negf %348 : vector<2x128xf32>
    %350 = math.exp %349 : vector<2x128xf32>
    %cst_129 = arith.constant 1.000000e+00 : f32
    %351 = vector.broadcast %cst_129 : f32 to vector<2x128xf32>
    %352 = arith.addf %351, %350 : vector<2x128xf32>
    %353 = arith.divf %351, %352 : vector<2x128xf32>
    %354 = math.tanh %348 : vector<2x128xf32>
    %355 = arith.select %5, %354, %353 : vector<2x128xi1>, vector<2x128xf32>
    %356 = vector.extract_strided_slice %355 {offsets = [0, 0], sizes = [2, 32], strides = [1, 1]} : vector<2x128xf32> to vector<2x32xf32>
    %357 = vector.extract_strided_slice %355 {offsets = [0, 32], sizes = [2, 32], strides = [1, 1]} : vector<2x128xf32> to vector<2x32xf32>
    %358 = vector.extract_strided_slice %355 {offsets = [0, 64], sizes = [2, 32], strides = [1, 1]} : vector<2x128xf32> to vector<2x32xf32>
    %359 = vector.extract_strided_slice %355 {offsets = [0, 96], sizes = [2, 32], strides = [1, 1]} : vector<2x128xf32> to vector<2x32xf32>
    %360 = arith.mulf %357, %338 : vector<2x32xf32>
    %361 = arith.mulf %356, %358 : vector<2x32xf32>
    %362 = arith.addf %360, %361 : vector<2x32xf32>
    %363 = math.tanh %362 : vector<2x32xf32>
    %364 = arith.mulf %359, %363 : vector<2x32xf32>
    %c5_130 = arith.constant 5 : index
    %c0_131 = arith.constant 0 : index
    %c0_132 = arith.constant 0 : index
    %365 = vector.load %arg11[%c5_130, %c0_131, %c0_132] : memref<8x2x32xf32, #tpu.memory_space<vmem>>, vector<1x2x32xf32>
    %366 = vector.shape_cast %365 : vector<1x2x32xf32> to vector<2x32xf32>
    %367 = vector.shape_cast %364 : vector<2x32xf32> to vector<1x2x32xf32>
    tpu.vector_store %arg11[%c5_130, %c0_131, %c0_132], %367 {strides = array<i32>} : memref<8x2x32xf32, #tpu.memory_space<vmem>>, vector<1x2x32xf32>,
    %c6_133 = arith.constant 6 : index
    %c0_134 = arith.constant 0 : index
    %c0_135 = arith.constant 0 : index
    %368 = vector.load %arg12[%c6_133, %c0_134, %c0_135] : memref<8x2x128xf32, #tpu.memory_space<vmem>>, vector<1x2x128xf32>
    %369 = vector.shape_cast %368 : vector<1x2x128xf32> to vector<2x128xf32>
    %370 = arith.truncf %364 : vector<2x32xf32> to vector<2x32xbf16>
    %cst_136 = arith.constant dense<0.000000e+00> : vector<2x128xf32>
    %371 = tpu.matmul %370, %212, %cst_136 {dimension_numbers = #tpu.dot_dimension_numbers<[1], [0], [0], [1], [0, 0, 1, 1], [], []>} : vector<2x32xbf16>, vector<32x128xbf16>, vector<2x128xf32> -> vector<2x128xf32>
    %372 = arith.addf %369, %371 : vector<2x128xf32>
    %373 = arith.negf %372 : vector<2x128xf32>
    %374 = math.exp %373 : vector<2x128xf32>
    %cst_137 = arith.constant 1.000000e+00 : f32
    %375 = vector.broadcast %cst_137 : f32 to vector<2x128xf32>
    %376 = arith.addf %375, %374 : vector<2x128xf32>
    %377 = arith.divf %375, %376 : vector<2x128xf32>
    %378 = math.tanh %372 : vector<2x128xf32>
    %379 = arith.select %5, %378, %377 : vector<2x128xi1>, vector<2x128xf32>
    %380 = vector.extract_strided_slice %379 {offsets = [0, 0], sizes = [2, 32], strides = [1, 1]} : vector<2x128xf32> to vector<2x32xf32>
    %381 = vector.extract_strided_slice %379 {offsets = [0, 32], sizes = [2, 32], strides = [1, 1]} : vector<2x128xf32> to vector<2x32xf32>
    %382 = vector.extract_strided_slice %379 {offsets = [0, 64], sizes = [2, 32], strides = [1, 1]} : vector<2x128xf32> to vector<2x32xf32>
    %383 = vector.extract_strided_slice %379 {offsets = [0, 96], sizes = [2, 32], strides = [1, 1]} : vector<2x128xf32> to vector<2x32xf32>
    %384 = arith.mulf %381, %362 : vector<2x32xf32>
    %385 = arith.mulf %380, %382 : vector<2x32xf32>
    %386 = arith.addf %384, %385 : vector<2x32xf32>
    %387 = math.tanh %386 : vector<2x32xf32>
    %388 = arith.mulf %383, %387 : vector<2x32xf32>
    %c6_138 = arith.constant 6 : index
    %c0_139 = arith.constant 0 : index
    %c0_140 = arith.constant 0 : index
    %389 = vector.load %arg11[%c6_138, %c0_139, %c0_140] : memref<8x2x32xf32, #tpu.memory_space<vmem>>, vector<1x2x32xf32>
    %390 = vector.shape_cast %389 : vector<1x2x32xf32> to vector<2x32xf32>
    %391 = vector.shape_cast %388 : vector<2x32xf32> to vector<1x2x32xf32>
    tpu.vector_store %arg11[%c6_138, %c0_139, %c0_140], %391 {strides = array<i32>} : memref<8x2x32xf32, #tpu.memory_space<vmem>>, vector<1x2x32xf32>,
    %c7_141 = arith.constant 7 : index
    %c0_142 = arith.constant 0 : index
    %c0_143 = arith.constant 0 : index
    %392 = vector.load %arg12[%c7_141, %c0_142, %c0_143] : memref<8x2x128xf32, #tpu.memory_space<vmem>>, vector<1x2x128xf32>
    %393 = vector.shape_cast %392 : vector<1x2x128xf32> to vector<2x128xf32>
    %394 = arith.truncf %388 : vector<2x32xf32> to vector<2x32xbf16>
    %cst_144 = arith.constant dense<0.000000e+00> : vector<2x128xf32>
    %395 = tpu.matmul %394, %212, %cst_144 {dimension_numbers = #tpu.dot_dimension_numbers<[1], [0], [0], [1], [0, 0, 1, 1], [], []>} : vector<2x32xbf16>, vector<32x128xbf16>, vector<2x128xf32> -> vector<2x128xf32>
    %396 = arith.addf %393, %395 : vector<2x128xf32>
    %397 = arith.negf %396 : vector<2x128xf32>
    %398 = math.exp %397 : vector<2x128xf32>
    %cst_145 = arith.constant 1.000000e+00 : f32
    %399 = vector.broadcast %cst_145 : f32 to vector<2x128xf32>
    %400 = arith.addf %399, %398 : vector<2x128xf32>
    %401 = arith.divf %399, %400 : vector<2x128xf32>
    %402 = math.tanh %396 : vector<2x128xf32>
    %403 = arith.select %5, %402, %401 : vector<2x128xi1>, vector<2x128xf32>
    %404 = vector.extract_strided_slice %403 {offsets = [0, 0], sizes = [2, 32], strides = [1, 1]} : vector<2x128xf32> to vector<2x32xf32>
    %405 = vector.extract_strided_slice %403 {offsets = [0, 32], sizes = [2, 32], strides = [1, 1]} : vector<2x128xf32> to vector<2x32xf32>
    %406 = vector.extract_strided_slice %403 {offsets = [0, 64], sizes = [2, 32], strides = [1, 1]} : vector<2x128xf32> to vector<2x32xf32>
    %407 = vector.extract_strided_slice %403 {offsets = [0, 96], sizes = [2, 32], strides = [1, 1]} : vector<2x128xf32> to vector<2x32xf32>
    %408 = arith.mulf %405, %386 : vector<2x32xf32>
    %409 = arith.mulf %404, %406 : vector<2x32xf32>
    %410 = arith.addf %408, %409 : vector<2x32xf32>
    %411 = math.tanh %410 : vector<2x32xf32>
    %412 = arith.mulf %407, %411 : vector<2x32xf32>
    %c7_146 = arith.constant 7 : index
    %c0_147 = arith.constant 0 : index
    %c0_148 = arith.constant 0 : index
    %413 = vector.load %arg11[%c7_146, %c0_147, %c0_148] : memref<8x2x32xf32, #tpu.memory_space<vmem>>, vector<1x2x32xf32>
    %414 = vector.shape_cast %413 : vector<1x2x32xf32> to vector<2x32xf32>
    %415 = vector.shape_cast %412 : vector<2x32xf32> to vector<1x2x32xf32>
    tpu.vector_store %arg11[%c7_146, %c0_147, %c0_148], %415 {strides = array<i32>} : memref<8x2x32xf32, #tpu.memory_space<vmem>>, vector<1x2x32xf32>,
    %c0_149 = arith.constant 0 : index
    %c0_150 = arith.constant 0 : index
    %c0_151 = arith.constant 0 : index
    %416 = vector.load %arg11[%c0_149, %c0_150, %c0_151] : memref<8x2x32xf32, #tpu.memory_space<vmem>>, vector<8x2x32xf32>
    %cst_152 = arith.constant dense<0.000000e+00> : vector<8x2xf32>
    %417 = vector.multi_reduction <add>, %416, %cst_152 [2] : vector<8x2x32xf32> to vector<8x2xf32>
    %cst_153 = arith.constant 3.200000e+01 : f32
    %418 = vector.broadcast %cst_153 : f32 to vector<8x2xf32>
    %419 = arith.divf %417, %418 : vector<8x2xf32>
    %420 = tpu.transpose %419, [1, 0] : vector<8x2xf32> -> vector<2x8xf32>
    %cst_154 = arith.constant dense<0xFF800000> : vector<2xf32>
    %421 = vector.multi_reduction <maximumf>, %420, %cst_154 [1] : vector<2x8xf32> to vector<2xf32>
    %422 = vector.shape_cast %421 : vector<2xf32> to vector<2x1xf32>
    %423 = vector.broadcast %422 : vector<2x1xf32> to vector<2x8xf32>
    %424 = arith.subf %420, %423 : vector<2x8xf32>
    %425 = math.exp %424 : vector<2x8xf32>
    %cst_155 = arith.constant dense<0.000000e+00> : vector<2xf32>
    %426 = vector.multi_reduction <add>, %425, %cst_155 [1] : vector<2x8xf32> to vector<2xf32>
    %427 = vector.shape_cast %426 : vector<2xf32> to vector<2x1xf32>
    %428 = vector.broadcast %427 : vector<2x1xf32> to vector<2x8xf32>
    %429 = arith.divf %425, %428 : vector<2x8xf32>
    %430 = vector.extract_strided_slice %429 {offsets = [0, 0], sizes = [1, 8], strides = [1, 1]} : vector<2x8xf32> to vector<1x8xf32>
    %431 = vector.extract_strided_slice %416 {offsets = [0, 0, 0], sizes = [8, 1, 32], strides = [1, 1, 1]} : vector<8x2x32xf32> to vector<8x1x32xf32>
    %432 = vector.shape_cast %431 : vector<8x1x32xf32> to vector<8x32xf32>
    %cst_156 = arith.constant dense<0.000000e+00> : vector<1x32xf32>
    %433 = tpu.matmul %430, %432, %cst_156 {dimension_numbers = #tpu.dot_dimension_numbers<[1], [0], [0], [1], [0, 0, 1, 1], [], []>} : vector<1x8xf32>, vector<8x32xf32>, vector<1x32xf32> -> vector<1x32xf32>
    %434 = vector.extract_strided_slice %429 {offsets = [1, 0], sizes = [1, 8], strides = [1, 1]} : vector<2x8xf32> to vector<1x8xf32>
    %435 = vector.extract_strided_slice %416 {offsets = [0, 1, 0], sizes = [8, 1, 32], strides = [1, 1, 1]} : vector<8x2x32xf32> to vector<8x1x32xf32>
    %436 = vector.shape_cast %435 : vector<8x1x32xf32> to vector<8x32xf32>
    %cst_157 = arith.constant dense<0.000000e+00> : vector<1x32xf32>
    %437 = tpu.matmul %434, %436, %cst_157 {dimension_numbers = #tpu.dot_dimension_numbers<[1], [0], [0], [1], [0, 0, 1, 1], [], []>} : vector<1x8xf32>, vector<8x32xf32>, vector<1x32xf32> -> vector<1x32xf32>
    %438 = tpu.concatenate %433, %437 in 0 : vector<1x32xf32>, vector<1x32xf32> -> vector<2x32xf32>
    %439 = arith.truncf %438 : vector<2x32xf32> to vector<2x32xbf16>
    %c0_158 = arith.constant 0 : index
    %c0_159 = arith.constant 0 : index
    %440 = vector.load %arg7[%c0_158, %c0_159] : memref<32x4xbf16, #tpu.memory_space<vmem>>, vector<32x4xbf16>
    %cst_160 = arith.constant dense<0.000000e+00> : vector<2x4xf32>
    %441 = tpu.matmul %439, %440, %cst_160 {dimension_numbers = #tpu.dot_dimension_numbers<[1], [0], [0], [1], [0, 0, 1, 1], [], []>} : vector<2x32xbf16>, vector<32x4xbf16>, vector<2x4xf32> -> vector<2x4xf32>
    %c0_161 = arith.constant 0 : index
    %c0_162 = arith.constant 0 : index
    %442 = vector.load %arg8[%c0_161, %c0_162] : memref<1x4xf32, #tpu.memory_space<vmem>>, vector<1x4xf32>
    %443 = vector.broadcast %442 : vector<1x4xf32> to vector<2x4xf32>
    %444 = arith.addf %441, %443 : vector<2x4xf32>
    %c0_163 = arith.constant 0 : index
    %c0_164 = arith.constant 0 : index
    %445 = vector.load %arg9[%c0_163, %c0_164] : memref<2x4xf32, #tpu.memory_space<vmem>>, vector<2x4xf32>
    tpu.vector_store %arg9[%c0_163, %c0_164], %444 {strides = array<i32>} : memref<2x4xf32, #tpu.memory_space<vmem>>, vector<2x4xf32>,
    return
  }
}

</mosaic_0001>

<bundles_post_ra>
// kernel: tpu_custom_call.1
= control target key start
LH: loop header
LB: loop body
LE: loop exit
PB: predicated region body
PF: predicated region fallthrough
CT: control target
= control target key end

     0   :  { %14 = vsyncpa [#allocation6], 0  ;;  %s3103_s0 = inlined_call_operand.vmem [shape: f32[8,2,4], index: 0, kind: input, shape index: {}]   ;;  %s3104_s1 = inlined_call_operand.hbm [shape: bf16[4,128], index: 1, kind: input, shape index: {}]   ;;  %s3105_s2 = inlined_call_operand.vmem [shape: bf16[32,128], index: 2, kind: input, shape index: {}]   ;;  %s3106_s3 = inlined_call_operand.vmem [shape: f32[1,128], index: 3, kind: input, shape index: {}]   ;;  %s3107_s4 = inlined_call_operand.vmem [shape: bf16[32,128], index: 4, kind: input, shape index: {}]   ;;  %s3108_s5 = inlined_call_operand.vmem [shape: bf16[32,128], index: 5, kind: input, shape index: {}]   ;;  %s3109_s6 = inlined_call_operand.vmem [shape: f32[1,128], index: 6, kind: input, shape index: {}]   ;;  %s3110_s7 = inlined_call_operand.vmem [shape: bf16[32,4], index: 7, kind: input, shape index: {}]   ;;  %s3111_s8 = inlined_call_operand.vmem [shape: f32[1,4], index: 8, kind: input, shape index: {}]   ;;  %s3112_s9 = inlined_call_operand.hbm [shape: f32[2,4], index: 9, kind: output, shape index: {}]  }
   0x1   :  { %15 = vsyncpa [#allocation7], 0  ;;  %s2577_s30 = smov [#allocation5]   ;;  %s2529_s13 = scalar_lea.hbm %s3104_s1, 32 }
   0x2   :  { %s24_s10 = sshll.u32 %s2577_s30, 4  ;;  %p2530_p0 = scmp.ne.s32.totalorder %s3104_s1, %s2529_s13  ;;  %s25_s10 = int_to_ptr.vmem [resolvable:$true] %s24_s10 }
   0x3   :  { %p2533_p1 = scmp.lt.u32.totalorder %s2529_s13, %s3104_s1 }
   0x5   :  { %p2535_p2 = pnand %p2533_p1, %p2530_p0 }
   0x7   :  { %2538 = shalt.err (!%p2535_p2)
}
   0x8   :  { %s2539_s18 = scalar_lea.vmem %s25_s10, 32  ;;  %p2544_p4 = scmp.lt.s32.totalorder %s25_s10, %s25_s10 }
   0x9   :  { %p2540_p3 = scmp.ne.s32.totalorder %s25_s10, %s2539_s18  ;;  %p2545_p5 = scmp.lt.s32.totalorder %s2539_s18, %s2539_s18 }
   0xb   :  { %p2546_p6 = por %p2545_p5, %p2544_p4 }
   0xd   :  { %p2547_p7 = pnand %p2546_p6, %p2540_p3 }
   0xf   :  { %2550 = shalt.err (!%p2547_p7)
}
  0x10   :  { %27 = dma.hbm_to_vmem [thread:$0]  %s3104_s1, 32, %s25_s10, [#allocation6]  }
  0x11   :  { %2573 = dma.done.wait [#allocation6], 32  }
  0x12   :  { %2574 = vsyncadd [#allocation6], 4294967264  ;;  %v46_v0 = vlaneseq  ;;  %v2578_v1 = vmov 0.0   ;;  %vm2579_vm0 = vmmov 0   ;;  %v2580_v2 = vmov 1983009808  }
  0x13   :  { %2221 = vmatprep.subr.bf16.mxu0 %v2578_v1  ;;  %2223 = vmatprep.mubr.msk.bf16.mxu0 %vm2579_vm0, %v2578_v1  ;;  %v76_v3 = vunpack.c.l.s4 %v2580_v2  ;;  %vm120_vm1 = vcmask 1041408   ;;  %v51_v7 = vld [vmem:[#allocation5] sm:$0x3]  ;;  %v58_v9 = vld [vmem:[%s3103_s0 + $0x2] sm:$0x3]  ;;  %v2696_v24 = vld [vmem:[%s3105_s2 + $0x8] sm:$0xff]  }
  0x14   :  { %2227 = vmatprep.subr.bf16.mxu1 %v2578_v1  ;;  %v2652_v4 = vshrl.u32 %v46_v0, 7  ;;  %2231 = vmatprep.mubr.msk.bf16.mxu1 %vm2579_vm0, %v2578_v1  ;;  %v57_v8 = vld [vmem:[%s3103_s0] sm:$0x3]  ;;  %v122_v10 = vsel %vm120_vm1, %v51_v7, 0  ;;  %v59_v11 = vld [vmem:[%s3103_s0 + $0x4] sm:$0x3] }
  0x15   :  { %v77_v5 = vunpack.c.0.s8 %v76_v3  ;;  %v60_v12 = vld [vmem:[%s3103_s0 + $0x6] sm:$0x3]  ;;  %v73_v13 = vcombine.low %v57_v8, %v58_v9  ;;  %2222 = vmatpush3.bf16.msra.mxu0 %v122_v10  ;;  %v61_v15 = vld [vmem:[%s3103_s0 + $0x8] sm:$0x3]  ;;  %v62_v16 = vld [vmem:[%s3103_s0 + $0xa] sm:$0x3] }
  0x16   :  { %v2674_v14 = vld [vmem:[%s3105_s2] sm:$0xff]   ;;  %v63_v17 = vld [vmem:[%s3103_s0 + $0xc] sm:$0x3]  ;;  %v74_v18 = vcombine.low %v59_v11, %v60_v12  ;;  %v64_v19 = vld [vmem:[%s3103_s0 + $0xe] sm:$0x3]  ;;  %v90_v21 = vcombine.low %v61_v15, %v62_v16  ;;  %2235 = vmatprep.subr.bf16.mxu0 %v2578_v1  ;;  %vm116_vm2 = vcmask 31744  }
  0x17   :  { %v2657_v6 = vsub.s32 %v77_v5, %v2652_v4  ;;  %2228 = vmatpush3.bf16.msra.mxu1 %v2674_v14  ;;  %v91_v23 = vcombine.low %v63_v17, %v64_v19  ;;  %v2581_v30 = vmov 0   ;;  %v2107_v31 = vld [vmem:[%s3106_s3] ss:$0 sm:$0xff]  ;;  %v2723_v57 = vand.u32 127, %v46_v0  ;;  %s2582_s3 = smov 64   ;;  %s2583_s19 = smov 32  }
  0x18   :  { %2229 = vmatprep.subr.bf16.mxu1 %v2578_v1  ;;  %vm230_vm6 = vcmask 261120   ;;  %vm304_vm7 = vcmask 254976   ;;  %vm1774_vm8 = vcmask 1041409   ;;  %vm1776_vm9 = vcmask 1042434   ;;  %s2584_s11 = smov [#allocation8]  }
  0x19   :  { %v81_v20 = vrot.slane %v73_v13, %v2657_v6  ;;  %v88_v22 = vrot.slane %v74_v18, %v2657_v6  ;;  %v98_v25 = vrot.slane %v90_v21, %v2657_v6  ;;  %v105_v27 = vrot.slane %v91_v23, %v2657_v6  ;;  %s2098_s12 = sshll.u32 %s2584_s11, 4  ;;  %s2099_s12 = int_to_ptr.vmem [resolvable:$true] %s2098_s12 }
  0x1a   :  { %vm48_vm3 = vcmp.ge.s32.totalorder %v2723_v57, 64  ;;  %vm49_vm4 = vcmp.lt.s32.totalorder %v2723_v57, 96  ;;  %vm1778_vm10 = vcmask 1043459   ;;  %vm1780_vm11 = vcmask 1044484   ;;  %p2556_p9 = scmp.lt.s32.totalorder %s2099_s12, %s2099_s12 }
  0x1b   :  { %v89_v26 = vcombine.low %v81_v20, %v88_v22  ;;  %2230 = vmatpush3.bf16.msra.mxu1 %v2696_v24  ;;  %v106_v28 = vcombine.low %v98_v25, %v105_v27  ;;  %vm2727_vm5 = vmand %vm48_vm3, %vm49_vm4  ;;  %vm1782_vm12 = vcmask 1045509   ;;  %vm1784_vm13 = vcmask 1046534  }
  0x1c   :  { %2243 = vmatprep.subr.bf16.mxu1 %v2578_v1  ;;  %vm1786_vm14 = vcmask 1047559   ;;  %vm1821_vm15 = vcmask 58368   ;;  %vm1856_vm1 = vcmask 64512  }
  0x1d   :  { %v109_v29 = vpack.c.bf16 %v106_v28, %v89_v26 }
  0x1e   :  { %2232 = vmatmul.mubr.bf16.vlgmr.msra.gmra.mrb[0].mxu1 %v2581_v30 }
  0x1f   :  { %2244 = vmatpush3.bf16.msra.mxu1 %v2674_v14  ;;  %2247 = vmatprep.mubr.msk.bf16.mxu1 %vm2579_vm0, %v2578_v1 }
  0x20   :  { %2224 = vmatmul.mubr.msk.bf16.vlgmr.msra.gmra.mrb[0].mxu0 %vm116_vm2, %v109_v29  ;;  %2245 = vmatprep.subr.bf16.mxu1 %v2578_v1  ;;  %vm2021_vm2 = vcmask 1040384  }
  0x21   :  { %2236 = vmatpush3.bf16.msra.mxu0 %v2674_v14  ;;  %2239 = vmatprep.mubr.msk.bf16.mxu0 %vm2579_vm0, %v2578_v1 }
  0x22   :  { %2237 = vmatprep.subr.bf16.mxu0 %v2578_v1 }
  0x23   :  { %2246 = vmatpush3.bf16.msra.mxu1 %v2696_v24 }
  0x24   :  { %2259 = vmatprep.subr.bf16.mxu1 %v2578_v1 }
  0x25   :  { %2238 = vmatpush3.bf16.msra.mxu0 %v2696_v24 }
  0x26   :  { %2251 = vmatprep.subr.bf16.mxu0 %v2578_v1 }
  0xf1   :  { %v268_v32 = vpop.f32.mrb[0].mxu1 }
  0xf2   :  { %v2233_v33 = vpop.f32.mrb[1].mxu1 }
  0xf3   :  { %v158_v34 = vpop.f32.mrb[0].mxu0  ;;  %v271_v35 = vpop.f32.mrb[2].mxu1 }
  0xf4   :  { %v159_v36 = vadd.f32 %v2107_v31, %v158_v34  ;;  %v2225_v37 = vpop.f32.mrb[1].mxu0  ;;  %v2234_v38 = vpop.f32.mrb[3].mxu1 }
  0xf5   :  { %v161_v39 = vpop.f32.mrb[2].mxu0 }
  0xf6   :  { %v167_v40 = vcombine.high %v159_v36, %v159_v36  ;;  %v174_v41 = vrot.slane %v159_v36, %v2657_v6  ;;  %2109 = vst.sshfl [vmem:[#allocation4] sm:$0x3 pattern:$0x76325410] %v159_v36  ;;  %v162_v42 = vadd.f32 %v2107_v31, %v161_v39  ;;  %v2226_v43 = vpop.f32.mrb[3].mxu0 }
  0xf8   :  { %v181_v44 = vrot.slane %v167_v40, %v2657_v6  ;;  %v182_v45 = vcombine.high %v174_v41, %v174_v41  ;;  %2110 = vst.sshfl [vmem:[#allocation4 + $0x4] sm:$0x3 pattern:$0x76325410] %v167_v40  ;;  %v184_v46 = vcombine.high %v162_v42, %v162_v42  ;;  %v191_v47 = vrot.slane %v162_v42, %v2657_v6 }
  0xf9   :  { %2111 = vst.sshfl [vmem:[#allocation4 + $0x8] sm:$0x3 pattern:$0x76325410] %v162_v42 }
  0xfa   :  { %v183_v48 = vcombine.high %v181_v44, %v181_v44  ;;  %210 = vst [vmem:[#allocation4 + $0x2] sm:$0x3] %v182_v45  ;;  %v198_v49 = vrot.slane %v184_v46, %v2657_v6  ;;  %v199_v50 = vcombine.high %v191_v47, %v191_v47  ;;  %2112 = vst.sshfl [vmem:[#allocation4 + $0xc] sm:$0x3 pattern:$0x76325410] %v184_v46 }
  0xfc   :  { %212 = vst [vmem:[#allocation4 + $0x6] sm:$0x3] %v183_v48  ;;  %v200_v51 = vcombine.high %v198_v49, %v198_v49  ;;  %214 = vst [vmem:[#allocation4 + $0xa] sm:$0x3] %v199_v50 }
  0xfd   :  { %v217_v52 = vld [vmem:[#allocation4] sm:$0x3] }
  0xfe   :  { %216 = vst [vmem:[#allocation4 + $0xe] sm:$0x3] %v200_v51  ;;  %v274_v53 = vadd.f32 %v268_v32, %v217_v52 }
  0xff   :  { %v388_v36 = vld [vmem:[#allocation4 + $0x4] sm:$0x3] }
 0x100   :  { %v2115_v54 = vmul.f32 -1.442695, %v274_v53 }
 0x101   :  { %v307_v11 = vld [vmem:[#allocation4 + $0x2] sm:$0x3] }
 0x102   :  { %2397 = vpow2.f32 %v2115_v54 }
 0x103   :  { %2399 = vtanh.f32 %v274_v53 }
 0x10c   :  { %v2398_v55 = vpop.eup %2397 }
 0x10d   :  { %v278_v56 = vadd.f32 1.0, %v2398_v55  ;;  %v2400_v59 = vpop.eup %2399 }
 0x10f   :  { %2401 = vrcp.f32 %v278_v56 }
 0x119   :  { %v2402_v60 = vpop.eup %2401 }
 0x11a   :  { %v282_v61 = vsel %vm2727_vm5, %v2400_v59, %v2402_v60  ;;  %v469_v60 = vld [vmem:[#allocation4 + $0x6] sm:$0x3] }
 0x11b   :  { %285 = vrot.lane.b32.xlu0 %v282_v61, %s2582_s3  ;;  %v283_v0 = vmul.f32 0.0, %v282_v61 }
 0x18d   :  { %v286_v62 = vpop.permute.xlu0 %285 }
 0x18e   :  { %v288_v63 = vmul.f32 %v286_v62, %v282_v61 }
 0x190   :  { %290 = vrot.lane.b32.xlu0 %v288_v63, %s2583_s19 }
 0x202   :  { %v291_v2 = vpop.permute.xlu0 %290 }
 0x203   :  { %v293_v3 = vadd.f32 %v291_v2, %v283_v0 }
 0x205   :  { %2403 = vtanh.f32 %v293_v3 }
 0x20f   :  { %v2404_v5 = vpop.eup %2403 }
 0x210   :  { %296 = vrot.lane.b32.xlu1 %v2404_v5, %s2582_s3 }
 0x282   :  { %v297_v7 = vpop.permute.xlu1 %296 }
 0x283   :  { %v2736_v8 = vmul.f32 %v297_v7, %v282_v61 }
 0x285   :  { %v308_v9 = vpack.c.bf16 %v2736_v8, %v2736_v8 }
 0x287   :  { %310 = vrot.lane.b32.xlu1 %v308_v9, %s2583_s19 }
 0x2f9   :  { %v311_v10 = vpop.permute.xlu1 %310 }
 0x2fa   :  { %2240 = vmatmul.mubr.msk.bf16.vlgmr.msra.gmra.mrb[4].mxu0 %vm230_vm6, %v311_v10 }
 0x2fb   :  { %2252 = vmatpush3.bf16.msra.mxu0 %v2674_v14  ;;  %2255 = vmatprep.mubr.msk.bf16.mxu0 %vm2579_vm0, %v2578_v1 }
 0x2fc   :  { %2253 = vmatprep.subr.bf16.mxu0 %v2578_v1 }
 0x2ff   :  { %2254 = vmatpush3.bf16.msra.mxu0 %v2696_v24 }
 0x300   :  { %2267 = vmatprep.subr.bf16.mxu0 %v2578_v1 }
 0x3cd   :  { %v349_v12 = vpop.f32.mrb[4].mxu0 }
 0x3ce   :  { %v355_v13 = vadd.f32 %v349_v12, %v307_v11  ;;  %v2241_v15 = vpop.f32.mrb[5].mxu0 }
 0x3cf   :  { %v352_v16 = vpop.f32.mrb[6].mxu0 }
 0x3d0   :  { %v2117_v17 = vmul.f32 -1.442695, %v355_v13  ;;  %v2242_v18 = vpop.f32.mrb[7].mxu0 }
 0x3d2   :  { %2405 = vpow2.f32 %v2117_v17 }
 0x3d3   :  { %2407 = vtanh.f32 %v355_v13 }
 0x3dc   :  { %v2406_v19 = vpop.eup %2405 }
 0x3dd   :  { %v359_v20 = vadd.f32 1.0, %v2406_v19  ;;  %v2408_v21 = vpop.eup %2407 }
 0x3df   :  { %2409 = vrcp.f32 %v359_v20 }
 0x3e9   :  { %v2410_v22 = vpop.eup %2409 }
 0x3ea   :  { %v363_v23 = vsel %vm2727_vm5, %v2408_v21, %v2410_v22 }
 0x3eb   :  { %366 = vrot.lane.b32.xlu0 %v363_v23, %s2582_s3  ;;  %v364_v27 = vmul.f32 %v363_v23, %v293_v3 }
 0x45d   :  { %v367_v25 = vpop.permute.xlu0 %366 }
 0x45e   :  { %v369_v26 = vmul.f32 %v367_v25, %v363_v23 }
 0x460   :  { %371 = vrot.lane.b32.xlu1 %v369_v26, %s2583_s19 }
 0x4d2   :  { %v372_v28 = vpop.permute.xlu1 %371 }
 0x4d3   :  { %v374_v29 = vadd.f32 %v372_v28, %v364_v27 }
 0x4d5   :  { %2411 = vtanh.f32 %v374_v29 }
 0x4df   :  { %v2412_v31 = vpop.eup %2411 }
 0x4e0   :  { %377 = vrot.lane.b32.xlu0 %v2412_v31, %s2582_s3 }
 0x552   :  { %v378_v32 = vpop.permute.xlu0 %377 }
 0x553   :  { %v2753_v33 = vmul.f32 %v378_v32, %v363_v23  ;;  %v550_v23 = vld [vmem:[#allocation4 + $0x8] sm:$0x3] }
 0x555   :  { %v389_v34 = vpack.c.bf16 %v2753_v33, %v2753_v33 }
 0x557   :  { %391 = vrot.lane.b32.xlu1 %v389_v34, %s2583_s19 }
 0x5c9   :  { %v392_v35 = vpop.permute.xlu1 %391 }
 0x5ca   :  { %2248 = vmatmul.mubr.msk.bf16.vlgmr.msra.gmra.mrb[4].mxu1 %vm230_vm6, %v392_v35 }
 0x5cb   :  { %2260 = vmatpush3.bf16.msra.mxu1 %v2674_v14  ;;  %2263 = vmatprep.mubr.msk.bf16.mxu1 %vm2579_vm0, %v2578_v1 }
 0x5cc   :  { %2261 = vmatprep.subr.bf16.mxu1 %v2578_v1 }
 0x5cf   :  { %2262 = vmatpush3.bf16.msra.mxu1 %v2696_v24 }
 0x5d0   :  { %2275 = vmatprep.subr.bf16.mxu1 %v2578_v1 }
 0x69d   :  { %v430_v37 = vpop.f32.mrb[4].mxu1 }
 0x69e   :  { %v436_v38 = vadd.f32 %v430_v37, %v388_v36  ;;  %v2249_v39 = vpop.f32.mrb[5].mxu1 }
 0x69f   :  { %v433_v40 = vpop.f32.mrb[6].mxu1 }
 0x6a0   :  { %v2119_v41 = vmul.f32 -1.442695, %v436_v38  ;;  %v2250_v42 = vpop.f32.mrb[7].mxu1 }
 0x6a2   :  { %2413 = vpow2.f32 %v2119_v41 }
 0x6a3   :  { %2415 = vtanh.f32 %v436_v38 }
 0x6ac   :  { %v2414_v43 = vpop.eup %2413 }
 0x6ad   :  { %v440_v44 = vadd.f32 1.0, %v2414_v43  ;;  %v2416_v45 = vpop.eup %2415 }
 0x6af   :  { %2417 = vrcp.f32 %v440_v44 }
 0x6b9   :  { %v2418_v46 = vpop.eup %2417 }
 0x6ba   :  { %v444_v47 = vsel %vm2727_vm5, %v2416_v45, %v2418_v46 }
 0x6bb   :  { %447 = vrot.lane.b32.xlu0 %v444_v47, %s2582_s3  ;;  %v445_v50 = vmul.f32 %v444_v47, %v374_v29 }
 0x72d   :  { %v448_v48 = vpop.permute.xlu0 %447 }
 0x72e   :  { %v450_v49 = vmul.f32 %v448_v48, %v444_v47  ;;  %v631_v48 = vld [vmem:[#allocation4 + $0xa] sm:$0x3] }
 0x730   :  { %452 = vrot.lane.b32.xlu1 %v450_v49, %s2583_s19 }
 0x7a2   :  { %v453_v51 = vpop.permute.xlu1 %452 }
 0x7a3   :  { %v455_v52 = vadd.f32 %v453_v51, %v445_v50 }
 0x7a5   :  { %2419 = vtanh.f32 %v455_v52 }
 0x7af   :  { %v2420_v53 = vpop.eup %2419 }
 0x7b0   :  { %458 = vrot.lane.b32.xlu0 %v2420_v53, %s2582_s3 }
 0x822   :  { %v459_v54 = vpop.permute.xlu0 %458 }
 0x823   :  { %v2770_v55 = vmul.f32 %v459_v54, %v444_v47 }
 0x825   :  { %v470_v56 = vpack.c.bf16 %v2770_v55, %v2770_v55 }
 0x827   :  { %472 = vrot.lane.b32.xlu1 %v470_v56, %s2583_s19 }
 0x899   :  { %v473_v59 = vpop.permute.xlu1 %472 }
 0x89a   :  { %2256 = vmatmul.mubr.msk.bf16.vlgmr.msra.gmra.mrb[8].mxu0 %vm230_vm6, %v473_v59 }
 0x89b   :  { %2268 = vmatpush3.bf16.msra.mxu0 %v2674_v14  ;;  %2271 = vmatprep.mubr.msk.bf16.mxu0 %vm2579_vm0, %v2578_v1 }
 0x89c   :  { %2269 = vmatprep.subr.bf16.mxu0 %v2578_v1 }
 0x89f   :  { %2270 = vmatpush3.bf16.msra.mxu0 %v2696_v24 }
 0x8a0   :  { %2283 = vmatprep.subr.bf16.mxu0 %v2578_v1 }
 0x96d   :  { %v511_v61 = vpop.f32.mrb[8].mxu0 }
 0x96e   :  { %v517_v62 = vadd.f32 %v511_v61, %v469_v60  ;;  %v2257_v63 = vpop.f32.mrb[9].mxu0 }
 0x96f   :  { %v514_v0 = vpop.f32.mrb[10].mxu0 }
 0x970   :  { %v2121_v2 = vmul.f32 -1.442695, %v517_v62  ;;  %v2258_v3 = vpop.f32.mrb[11].mxu0 }
 0x972   :  { %2421 = vpow2.f32 %v2121_v2 }
 0x973   :  { %2423 = vtanh.f32 %v517_v62 }
 0x97c   :  { %v2422_v5 = vpop.eup %2421 }
 0x97d   :  { %v521_v7 = vadd.f32 1.0, %v2422_v5  ;;  %v2424_v9 = vpop.eup %2423 }
 0x97f   :  { %2425 = vrcp.f32 %v521_v7 }
 0x989   :  { %v2426_v10 = vpop.eup %2425 }
 0x98a   :  { %v525_v11 = vsel %vm2727_vm5, %v2424_v9, %v2426_v10 }
 0x98b   :  { %528 = vrot.lane.b32.xlu0 %v525_v11, %s2582_s3  ;;  %v526_v15 = vmul.f32 %v525_v11, %v455_v52 }
 0x9fd   :  { %v529_v12 = vpop.permute.xlu0 %528 }
 0x9fe   :  { %v531_v13 = vmul.f32 %v529_v12, %v525_v11 }
 0xa00   :  { %533 = vrot.lane.b32.xlu1 %v531_v13, %s2583_s19 }
 0xa72   :  { %v534_v16 = vpop.permute.xlu1 %533 }
 0xa73   :  { %v536_v17 = vadd.f32 %v534_v16, %v526_v15 }
 0xa75   :  { %2427 = vtanh.f32 %v536_v17 }
 0xa7f   :  { %v2428_v18 = vpop.eup %2427 }
 0xa80   :  { %539 = vrot.lane.b32.xlu0 %v2428_v18, %s2582_s3 }
 0xaf2   :  { %v540_v19 = vpop.permute.xlu0 %539 }
 0xaf3   :  { %v2787_v20 = vmul.f32 %v540_v19, %v525_v11  ;;  %v712_v11 = vld [vmem:[#allocation4 + $0xc] sm:$0x3] }
 0xaf5   :  { %v551_v21 = vpack.c.bf16 %v2787_v20, %v2787_v20 }
 0xaf7   :  { %553 = vrot.lane.b32.xlu1 %v551_v21, %s2583_s19 }
 0xb69   :  { %v554_v22 = vpop.permute.xlu1 %553 }
 0xb6a   :  { %2264 = vmatmul.mubr.msk.bf16.vlgmr.msra.gmra.mrb[8].mxu1 %vm230_vm6, %v554_v22 }
 0xb6b   :  { %2276 = vmatpush3.bf16.msra.mxu1 %v2674_v14  ;;  %2279 = vmatprep.mubr.msk.bf16.mxu1 %vm2579_vm0, %v2578_v1 }
 0xb6c   :  { %2277 = vmatprep.subr.bf16.mxu1 %v2578_v1 }
 0xb6f   :  { %2278 = vmatpush3.bf16.msra.mxu1 %v2696_v24 }
 0xb70   :  { %2291 = vmatprep.subr.bf16.mxu1 %v2578_v1 }
 0xc3d   :  { %v592_v25 = vpop.f32.mrb[8].mxu1 }
 0xc3e   :  { %v598_v26 = vadd.f32 %v592_v25, %v550_v23  ;;  %v2265_v27 = vpop.f32.mrb[9].mxu1 }
 0xc3f   :  { %v595_v28 = vpop.f32.mrb[10].mxu1 }
 0xc40   :  { %v2123_v29 = vmul.f32 -1.442695, %v598_v26  ;;  %v2266_v31 = vpop.f32.mrb[11].mxu1 }
 0xc42   :  { %2429 = vpow2.f32 %v2123_v29 }
 0xc43   :  { %2431 = vtanh.f32 %v598_v26 }
 0xc4c   :  { %v2430_v32 = vpop.eup %2429 }
 0xc4d   :  { %v602_v34 = vadd.f32 1.0, %v2430_v32  ;;  %v2432_v35 = vpop.eup %2431 }
 0xc4f   :  { %2433 = vrcp.f32 %v602_v34 }
 0xc59   :  { %v2434_v36 = vpop.eup %2433 }
 0xc5a   :  { %v606_v37 = vsel %vm2727_vm5, %v2432_v35, %v2434_v36 }
 0xc5b   :  { %609 = vrot.lane.b32.xlu0 %v606_v37, %s2582_s3  ;;  %v607_v40 = vmul.f32 %v606_v37, %v536_v17 }
 0xccd   :  { %v610_v38 = vpop.permute.xlu0 %609 }
 0xcce   :  { %v612_v39 = vmul.f32 %v610_v38, %v606_v37  ;;  %v793_v38 = vld [vmem:[#allocation4 + $0xe] sm:$0x3] }
 0xcd0   :  { %614 = vrot.lane.b32.xlu1 %v612_v39, %s2583_s19 }
 0xd42   :  { %v615_v41 = vpop.permute.xlu1 %614 }
 0xd43   :  { %v617_v42 = vadd.f32 %v615_v41, %v607_v40 }
 0xd45   :  { %2435 = vtanh.f32 %v617_v42 }
 0xd4f   :  { %v2436_v43 = vpop.eup %2435 }
 0xd50   :  { %620 = vrot.lane.b32.xlu0 %v2436_v43, %s2582_s3 }
 0xdc2   :  { %v621_v44 = vpop.permute.xlu0 %620 }
 0xdc3   :  { %v2804_v45 = vmul.f32 %v621_v44, %v606_v37 }
 0xdc5   :  { %v632_v46 = vpack.c.bf16 %v2804_v45, %v2804_v45 }
 0xdc7   :  { %634 = vrot.lane.b32.xlu1 %v632_v46, %s2583_s19 }
 0xe39   :  { %v635_v47 = vpop.permute.xlu1 %634 }
 0xe3a   :  { %2272 = vmatmul.mubr.msk.bf16.vlgmr.msra.gmra.mrb[12].mxu0 %vm230_vm6, %v635_v47 }
 0xe3b   :  { %2284 = vmatpush3.bf16.msra.mxu0 %v2674_v14  ;;  %2287 = vmatprep.mubr.msk.bf16.mxu0 %vm2579_vm0, %v2578_v1 }
 0xe3c   :  { %2285 = vmatprep.subr.bf16.mxu0 %v2578_v1 }
 0xe3f   :  { %2286 = vmatpush3.bf16.msra.mxu0 %v2696_v24 }
 0xe40   :  { %2299 = vmatprep.subr.bf16.mxu0 %v2578_v1 }
 0xf0d   :  { %v673_v49 = vpop.f32.mrb[12].mxu0 }
 0xf0e   :  { %v679_v50 = vadd.f32 %v673_v49, %v631_v48  ;;  %v2273_v51 = vpop.f32.mrb[13].mxu0 }
 0xf0f   :  { %v676_v52 = vpop.f32.mrb[14].mxu0 }
 0xf10   :  { %v2125_v53 = vmul.f32 -1.442695, %v679_v50  ;;  %v2274_v54 = vpop.f32.mrb[15].mxu0 }
 0xf12   :  { %2437 = vpow2.f32 %v2125_v53 }
 0xf13   :  { %2439 = vtanh.f32 %v679_v50 }
 0xf1c   :  { %v2438_v56 = vpop.eup %2437 }
 0xf1d   :  { %v683_v59 = vadd.f32 1.0, %v2438_v56  ;;  %v2440_v14 = vpop.eup %2439 }
 0xf1f   :  { %2441 = vrcp.f32 %v683_v59 }
 0xf29   :  { %v2442_v60 = vpop.eup %2441 }
 0xf2a   :  { %v687_v61 = vsel %vm2727_vm5, %v2440_v14, %v2442_v60 }
 0xf2b   :  { %690 = vrot.lane.b32.xlu0 %v687_v61, %s2582_s3  ;;  %v688_v63 = vmul.f32 %v687_v61, %v617_v42 }
 0xf9d   :  { %v691_v24 = vpop.permute.xlu0 %690 }
 0xf9e   :  { %v693_v62 = vmul.f32 %v691_v24, %v687_v61 }
 0xfa0   :  { %695 = vrot.lane.b32.xlu1 %v693_v62, %s2583_s19  ;;  %v2872_v62 = vld [vmem:[%s3108_s5] sm:$0xff]  }
0x1012   :  { %v696_v0 = vpop.permute.xlu1 %695 }
0x1013   :  { %v698_v2 = vadd.f32 %v696_v0, %v688_v63  ;;  %v2879_v63 = vld [vmem:[%s3108_s5 + $0x8] sm:$0xff]  }
0x1015   :  { %2443 = vtanh.f32 %v698_v2 }
0x101f   :  { %v2444_v3 = vpop.eup %2443 }
0x1020   :  { %701 = vrot.lane.b32.xlu0 %v2444_v3, %s2582_s3 }
0x1092   :  { %v702_v5 = vpop.permute.xlu0 %701 }
0x1093   :  { %v2821_v7 = vmul.f32 %v702_v5, %v687_v61  ;;  %v2392_v61 = vld [vmem:[%s3107_s4 + $0x8] sm:$0xff]  }
0x1095   :  { %v713_v9 = vpack.c.bf16 %v2821_v7, %v2821_v7 }
0x1097   :  { %715 = vrot.lane.b32.xlu1 %v713_v9, %s2583_s19 }
0x1109   :  { %v716_v10 = vpop.permute.xlu1 %715 }
0x110a   :  { %2280 = vmatmul.mubr.msk.bf16.vlgmr.msra.gmra.mrb[12].mxu1 %vm230_vm6, %v716_v10 }
0x110b   :  { %2295 = vmatprep.mubr.msk.bf16.mxu1 %vm2579_vm0, %v2578_v1 }
0x11dd   :  { %v754_v12 = vpop.f32.mrb[12].mxu1 }
0x11de   :  { %v760_v13 = vadd.f32 %v754_v12, %v712_v11  ;;  %v2281_v15 = vpop.f32.mrb[13].mxu1 }
0x11df   :  { %v757_v16 = vpop.f32.mrb[14].mxu1 }
0x11e0   :  { %v2127_v17 = vmul.f32 -1.442695, %v760_v13  ;;  %v2282_v18 = vpop.f32.mrb[15].mxu1 }
0x11e2   :  { %2445 = vpow2.f32 %v2127_v17 }
0x11e3   :  { %2447 = vtanh.f32 %v760_v13 }
0x11ec   :  { %v2446_v19 = vpop.eup %2445 }
0x11ed   :  { %v764_v21 = vadd.f32 1.0, %v2446_v19  ;;  %v2448_v22 = vpop.eup %2447 }
0x11ef   :  { %2449 = vrcp.f32 %v764_v21 }
0x11f9   :  { %v2450_v23 = vpop.eup %2449 }
0x11fa   :  { %v768_v25 = vsel %vm2727_vm5, %v2448_v22, %v2450_v23 }
0x11fb   :  { %771 = vrot.lane.b32.xlu0 %v768_v25, %s2582_s3  ;;  %v769_v28 = vmul.f32 %v768_v25, %v698_v2 }
0x126d   :  { %v772_v26 = vpop.permute.xlu0 %771 }
0x126e   :  { %v774_v27 = vmul.f32 %v772_v26, %v768_v25 }
0x1270   :  { %776 = vrot.lane.b32.xlu1 %v774_v27, %s2583_s19 }
0x12e2   :  { %v777_v29 = vpop.permute.xlu1 %776 }
0x12e3   :  { %v779_v31 = vadd.f32 %v777_v29, %v769_v28 }
0x12e5   :  { %2451 = vtanh.f32 %v779_v31 }
0x12ef   :  { %v2452_v32 = vpop.eup %2451 }
0x12f0   :  { %782 = vrot.lane.b32.xlu0 %v2452_v32, %s2582_s3 }
0x1362   :  { %v783_v34 = vpop.permute.xlu0 %782 }
0x1363   :  { %v785_v35 = vmul.f32 %v783_v34, %v768_v25  ;;  %v2130_v34 = vld [vmem:[%s3109_s6] ss:$0 sm:$0xff] }
0x1365   :  { %v794_v36 = vpack.c.bf16 %v785_v35, %v785_v35 }
0x1367   :  { %796 = vrot.lane.b32.xlu1 %v794_v36, %s2583_s19 }
0x13d9   :  { %v797_v37 = vpop.permute.xlu1 %796 }
0x13da   :  { %2288 = vmatmul.mubr.msk.bf16.vlgmr.msra.gmra.mrb[16].mxu0 %vm230_vm6, %v797_v37 }
0x13db   :  { %2303 = vmatprep.mubr.msk.bf16.mxu0 %vm2579_vm0, %v2578_v1  ;;  %2300 = vmatpush3.bf16.msra.mxu0 %v2872_v62 }
0x13dc   :  { %2301 = vmatprep.subr.bf16.mxu0 %v2578_v1 }
0x13df   :  { %2302 = vmatpush3.bf16.msra.mxu0 %v2879_v63 }
0x13e0   :  { %2315 = vmatprep.subr.bf16.mxu0 %v2578_v1 }
0x13e2   :  { %2304 = vmatmul.mubr.bf16.vlgmr.msra.gmra.mrb[20].mxu0 %v2581_v30 }
0x13e3   :  { %2316 = vmatpush3.bf16.msra.mxu0 %v2872_v62  ;;  %2319 = vmatprep.mubr.msk.bf16.mxu0 %vm2579_vm0, %v2578_v1 }
0x13e4   :  { %2317 = vmatprep.subr.bf16.mxu0 %v2578_v1 }
0x13e7   :  { %2318 = vmatpush3.bf16.msra.mxu0 %v2879_v63 }
0x13e8   :  { %2331 = vmatprep.subr.bf16.mxu0 %v2578_v1 }
0x14ad   :  { %v835_v39 = vpop.f32.mrb[16].mxu0 }
0x14ae   :  { %v841_v40 = vadd.f32 %v835_v39, %v793_v38  ;;  %v2289_v41 = vpop.f32.mrb[17].mxu0 }
0x14af   :  { %v838_v42 = vpop.f32.mrb[18].mxu0 }
0x14b0   :  { %v2129_v43 = vmul.f32 -1.442695, %v841_v40  ;;  %v2290_v44 = vpop.f32.mrb[19].mxu0 }
0x14b2   :  { %2453 = vpow2.f32 %v2129_v43 }
0x14b3   :  { %2455 = vtanh.f32 %v841_v40 }
0x14b5   :  { %v1096_v28 = vpop.f32.mrb[20].mxu0 }
0x14b6   :  { %v2305_v29 = vpop.f32.mrb[21].mxu0 }
0x14bc   :  { %v2454_v46 = vpop.eup %2453 }
0x14bd   :  { %v845_v47 = vadd.f32 1.0, %v2454_v46  ;;  %v2456_v48 = vpop.eup %2455 }
0x14bf   :  { %2457 = vrcp.f32 %v845_v47 }
0x14c9   :  { %v2458_v49 = vpop.eup %2457 }
0x14ca   :  { %v849_v50 = vsel %vm2727_vm5, %v2456_v48, %v2458_v49 }
0x14cb   :  { %852 = vrot.lane.b32.xlu0 %v849_v50, %s2582_s3  ;;  %v850_v53 = vmul.f32 %v849_v50, %v779_v31  ;;  %v1099_v31 = vpop.f32.mrb[22].mxu0 }
0x14cc   :  { %v2306_v32 = vpop.f32.mrb[23].mxu0 }
0x153d   :  { %v853_v51 = vpop.permute.xlu0 %852 }
0x153e   :  { %v855_v52 = vmul.f32 %v853_v51, %v849_v50 }
0x1540   :  { %857 = vrot.lane.b32.xlu1 %v855_v52, %s2583_s19 }
0x1544   :  { %301 = vrot.lane.b32.xlu1 %v2736_v8, %s2583_s19 }
0x1548   :  { %463 = vrot.lane.b32.xlu1 %v2770_v55, %s2583_s19 }
0x154c   :  { %625 = vrot.lane.b32.xlu1 %v2804_v45, %s2583_s19  ;;  %v2391_v45 = vld [vmem:[%s3107_s4] sm:$0xff]  }
0x154d   :  { %2292 = vmatpush3.bf16.msra.mxu1 %v2391_v45 }
0x154e   :  { %2293 = vmatprep.subr.bf16.mxu1 %v2578_v1 }
0x1550   :  { %787 = vrot.lane.b32.xlu1 %v785_v35, %s2583_s19 }
0x1551   :  { %2294 = vmatpush3.bf16.msra.mxu1 %v2392_v61 }
0x1552   :  { %2307 = vmatprep.subr.bf16.mxu1 %v2578_v1 }
0x15b2   :  { %v858_v54 = vpop.permute.xlu1 %857 }
0x15b3   :  { %v860_v56 = vadd.f32 %v858_v54, %v850_v53 }
0x15b5   :  { %2459 = vtanh.f32 %v860_v56 }
0x15b6   :  { %v302_v59 = vpop.permute.xlu1 %301 }
0x15b7   :  { %305 = vst.msk [vmem:[#allocation2] sm:$0x3] %vm304_vm7, %v302_v59 }
0x15ba   :  { %v464_v14 = vpop.permute.xlu1 %463 }
0x15bb   :  { %467 = vst.msk [vmem:[#allocation2 + $0x4] sm:$0x3] %vm304_vm7, %v464_v14 }
0x15be   :  { %v626_v8 = vpop.permute.xlu1 %625  ;;  %v882_v30 = vld [vmem:[#allocation2] sm:$0x3] }
0x15bf   :  { %v2460_v60 = vpop.eup %2459  ;;  %629 = vst.msk [vmem:[#allocation2 + $0x8] sm:$0x3] %vm304_vm7, %v626_v8 }
0x15c0   :  { %863 = vrot.lane.b32.xlu0 %v2460_v60, %s2582_s3 }
0x15c2   :  { %v788_v55 = vpop.permute.xlu1 %787  ;;  %v884_v9 = vld [vmem:[#allocation2 + $0x4] sm:$0x3] }
0x15c3   :  { %791 = vst.msk [vmem:[#allocation2 + $0xc] sm:$0x3] %vm304_vm7, %v788_v55 }
0x15c4   :  { %382 = vrot.lane.b32.xlu0 %v2753_v33, %s2583_s19 }
0x15c6   :  { %v886_v12 = vld [vmem:[#allocation2 + $0x8] sm:$0x3] }
0x15c8   :  { %544 = vrot.lane.b32.xlu0 %v2787_v20, %s2583_s19 }
0x15ca   :  { %v888_v16 = vld [vmem:[#allocation2 + $0xc] sm:$0x3] }
0x15cc   :  { %706 = vrot.lane.b32.xlu0 %v2821_v7, %s2583_s19 }
0x1632   :  { %v864_v33 = vpop.permute.xlu0 %863 }
0x1633   :  { %v866_v24 = vmul.f32 %v864_v33, %v849_v50 }
0x1635   :  { %868 = vrot.lane.b32.xlu0 %v866_v24, %s2583_s19 }
0x1636   :  { %v383_v20 = vpop.permute.xlu0 %382 }
0x1637   :  { %386 = vst.msk [vmem:[#allocation2 + $0x2] sm:$0x3] %vm304_vm7, %v383_v20 }
0x163a   :  { %v545_v0 = vpop.permute.xlu0 %544 }
0x163b   :  { %548 = vst.msk [vmem:[#allocation2 + $0x6] sm:$0x3] %vm304_vm7, %v545_v0 }
0x163e   :  { %v707_v2 = vpop.permute.xlu0 %706  ;;  %v883_v7 = vld [vmem:[#allocation2 + $0x2] sm:$0x3] }
0x163f   :  { %710 = vst.msk [vmem:[#allocation2 + $0xa] sm:$0x3] %vm304_vm7, %v707_v2  ;;  %v898_v13 = vcombine.low %v882_v30, %v883_v7 }
0x1641   :  { %v906_v21 = vrot.slane %v898_v13, %v2657_v6 }
0x1642   :  { %v885_v5 = vld [vmem:[#allocation2 + $0x6] sm:$0x3] }
0x1643   :  { %v899_v11 = vcombine.low %v884_v9, %v885_v5 }
0x1645   :  { %v913_v18 = vrot.slane %v899_v11, %v2657_v6 }
0x1646   :  { %v887_v10 = vld [vmem:[#allocation2 + $0xa] sm:$0x3] }
0x1647   :  { %v915_v15 = vcombine.low %v886_v12, %v887_v10  ;;  %v914_v25 = vcombine.low %v906_v21, %v913_v18 }
0x1649   :  { %v923_v22 = vrot.slane %v915_v15, %v2657_v6 }
0x16a7   :  { %v869_v3 = vpop.permute.xlu0 %868 }
0x16a8   :  { %872 = vst.msk [vmem:[#allocation2 + $0xe] sm:$0x3] %vm304_vm7, %v869_v3 }
0x16af   :  { %v889_v17 = vld [vmem:[#allocation2 + $0xe] sm:$0x3] }
0x16b0   :  { %v916_v19 = vcombine.low %v888_v16, %v889_v17 }
0x16b2   :  { %v930_v23 = vrot.slane %v916_v19, %v2657_v6 }
0x16b4   :  { %v931_v26 = vcombine.low %v923_v22, %v930_v23 }
0x16b6   :  { %v934_v27 = vpack.c.bf16 %v931_v26, %v914_v25 }
0x16b8   :  { %2296 = vmatmul.mubr.msk.bf16.vlgmr.msra.gmra.mrb[16].mxu1 %vm230_vm6, %v934_v27 }
0x16b9   :  { %2308 = vmatpush3.bf16.msra.mxu1 %v2872_v62  ;;  %2311 = vmatprep.mubr.msk.bf16.mxu1 %vm2579_vm0, %v2578_v1 }
0x16ba   :  { %2309 = vmatprep.subr.bf16.mxu1 %v2578_v1 }
0x16bd   :  { %2310 = vmatpush3.bf16.msra.mxu1 %v2879_v63 }
0x16be   :  { %2323 = vmatprep.subr.bf16.mxu1 %v2578_v1 }
0x178b   :  { %v990_v35 = vpop.f32.mrb[16].mxu1 }
0x178c   :  { %v991_v36 = vadd.f32 %v2130_v34, %v990_v35  ;;  %v2297_v37 = vpop.f32.mrb[17].mxu1 }
0x178d   :  { %v993_v38 = vpop.f32.mrb[18].mxu1 }
0x178e   :  { %v999_v39 = vcombine.high %v991_v36, %v991_v36  ;;  %v1006_v40 = vrot.slane %v991_v36, %v2657_v6  ;;  %2134 = vst.sshfl [vmem:[#allocation4] sm:$0x3 pattern:$0x76325410] %v991_v36  ;;  %v994_v41 = vadd.f32 %v2130_v34, %v993_v38  ;;  %v2298_v42 = vpop.f32.mrb[19].mxu1 }
0x1790   :  { %v1013_v43 = vrot.slane %v999_v39, %v2657_v6  ;;  %v1014_v44 = vcombine.high %v1006_v40, %v1006_v40  ;;  %2135 = vst.sshfl [vmem:[#allocation4 + $0x4] sm:$0x3 pattern:$0x76325410] %v999_v39  ;;  %v1016_v46 = vcombine.high %v994_v41, %v994_v41  ;;  %v1023_v47 = vrot.slane %v994_v41, %v2657_v6 }
0x1791   :  { %2136 = vst.sshfl [vmem:[#allocation4 + $0x8] sm:$0x3 pattern:$0x76325410] %v994_v41 }
0x1792   :  { %v1015_v48 = vcombine.high %v1013_v43, %v1013_v43  ;;  %1042 = vst [vmem:[#allocation4 + $0x2] sm:$0x3] %v1014_v44  ;;  %v1030_v49 = vrot.slane %v1016_v46, %v2657_v6  ;;  %v1031_v50 = vcombine.high %v1023_v47, %v1023_v47  ;;  %2137 = vst.sshfl [vmem:[#allocation4 + $0xc] sm:$0x3 pattern:$0x76325410] %v1016_v46 }
0x1794   :  { %1044 = vst [vmem:[#allocation4 + $0x6] sm:$0x3] %v1015_v48  ;;  %v1032_v51 = vcombine.high %v1030_v49, %v1030_v49  ;;  %1046 = vst [vmem:[#allocation4 + $0xa] sm:$0x3] %v1031_v50 }
0x1795   :  { %v1049_v52 = vld [vmem:[#allocation4] sm:$0x3] }
0x1796   :  { %1048 = vst [vmem:[#allocation4 + $0xe] sm:$0x3] %v1032_v51  ;;  %v1102_v53 = vadd.f32 %v1096_v28, %v1049_v52 }
0x1797   :  { %v1213_v32 = vld [vmem:[#allocation4 + $0x4] sm:$0x3] }
0x1798   :  { %v2140_v54 = vmul.f32 -1.442695, %v1102_v53 }
0x1799   :  { %v1133_v5 = vld [vmem:[#allocation4 + $0x2] sm:$0x3] }
0x179a   :  { %2461 = vpow2.f32 %v2140_v54 }
0x179b   :  { %2463 = vtanh.f32 %v1102_v53 }
0x17a4   :  { %v2462_v56 = vpop.eup %2461 }
0x17a5   :  { %v1106_v59 = vadd.f32 1.0, %v2462_v56  ;;  %v2464_v14 = vpop.eup %2463 }
0x17a7   :  { %2465 = vrcp.f32 %v1106_v59  ;;  %v1293_v59 = vld [vmem:[#allocation4 + $0x6] sm:$0x3] }
0x17b1   :  { %v2466_v8 = vpop.eup %2465 }
0x17b2   :  { %v1110_v60 = vsel %vm2727_vm5, %v2464_v14, %v2466_v8 }
0x17b3   :  { %1113 = vrot.lane.b32.xlu1 %v1110_v60, %s2582_s3  ;;  %v1111_v45 = vmul.f32 0.0, %v1110_v60 }
0x1825   :  { %v1114_v6 = vpop.permute.xlu1 %1113 }
0x1826   :  { %v1116_v55 = vmul.f32 %v1114_v6, %v1110_v60 }
0x1828   :  { %1118 = vrot.lane.b32.xlu0 %v1116_v55, %s2583_s19 }
0x189a   :  { %v1119_v61 = vpop.permute.xlu0 %1118 }
0x189b   :  { %v1121_v33 = vadd.f32 %v1119_v61, %v1111_v45 }
0x189d   :  { %2467 = vtanh.f32 %v1121_v33 }
0x18a7   :  { %v2468_v24 = vpop.eup %2467 }
0x18a8   :  { %1124 = vrot.lane.b32.xlu1 %v2468_v24, %s2582_s3 }
0x191a   :  { %v1125_v20 = vpop.permute.xlu1 %1124 }
0x191b   :  { %v2917_v0 = vmul.f32 %v1125_v20, %v1110_v60 }
0x191d   :  { %v1134_v2 = vpack.c.bf16 %v2917_v0, %v2917_v0 }
0x191f   :  { %1136 = vrot.lane.b32.xlu0 %v1134_v2, %s2583_s19 }
0x1991   :  { %v1137_v3 = vpop.permute.xlu0 %1136 }
0x1992   :  { %2312 = vmatmul.mubr.msk.bf16.vlgmr.msra.gmra.mrb[20].mxu1 %vm230_vm6, %v1137_v3 }
0x1993   :  { %2324 = vmatpush3.bf16.msra.mxu1 %v2872_v62  ;;  %2327 = vmatprep.mubr.msk.bf16.mxu1 %vm2579_vm0, %v2578_v1 }
0x1994   :  { %2325 = vmatprep.subr.bf16.mxu1 %v2578_v1 }
0x1997   :  { %2326 = vmatpush3.bf16.msra.mxu1 %v2879_v63 }
0x1998   :  { %2339 = vmatprep.subr.bf16.mxu1 %v2578_v1 }
0x1a65   :  { %v1175_v7 = vpop.f32.mrb[20].mxu1 }
0x1a66   :  { %v1181_v9 = vadd.f32 %v1175_v7, %v1133_v5  ;;  %v2313_v10 = vpop.f32.mrb[21].mxu1 }
0x1a67   :  { %v1178_v11 = vpop.f32.mrb[22].mxu1 }
0x1a68   :  { %v2142_v30 = vmul.f32 -1.442695, %v1181_v9  ;;  %v2314_v12 = vpop.f32.mrb[23].mxu1 }
0x1a6a   :  { %2469 = vpow2.f32 %v2142_v30 }
0x1a6b   :  { %2471 = vtanh.f32 %v1181_v9 }
0x1a74   :  { %v2470_v13 = vpop.eup %2469 }
0x1a75   :  { %v1185_v15 = vadd.f32 1.0, %v2470_v13  ;;  %v2472_v16 = vpop.eup %2471 }
0x1a77   :  { %2473 = vrcp.f32 %v1185_v15 }
0x1a81   :  { %v2474_v17 = vpop.eup %2473 }
0x1a82   :  { %v1189_v18 = vsel %vm2727_vm5, %v2472_v16, %v2474_v17  ;;  %v1373_v16 = vld [vmem:[#allocation4 + $0x8] sm:$0x3] }
0x1a83   :  { %1192 = vrot.lane.b32.xlu1 %v1189_v18, %s2582_s3  ;;  %v1190_v22 = vmul.f32 %v1189_v18, %v1121_v33 }
0x1af5   :  { %v1193_v19 = vpop.permute.xlu1 %1192 }
0x1af6   :  { %v1195_v21 = vmul.f32 %v1193_v19, %v1189_v18 }
0x1af8   :  { %1197 = vrot.lane.b32.xlu0 %v1195_v21, %s2583_s19 }
0x1b6a   :  { %v1198_v23 = vpop.permute.xlu0 %1197 }
0x1b6b   :  { %v1200_v25 = vadd.f32 %v1198_v23, %v1190_v22 }
0x1b6d   :  { %2475 = vtanh.f32 %v1200_v25 }
0x1b77   :  { %v2476_v26 = vpop.eup %2475 }
0x1b78   :  { %1203 = vrot.lane.b32.xlu1 %v2476_v26, %s2582_s3 }
0x1bea   :  { %v1204_v27 = vpop.permute.xlu1 %1203 }
0x1beb   :  { %v2934_v28 = vmul.f32 %v1204_v27, %v1189_v18 }
0x1bed   :  { %v1214_v29 = vpack.c.bf16 %v2934_v28, %v2934_v28 }
0x1bef   :  { %1216 = vrot.lane.b32.xlu0 %v1214_v29, %s2583_s19 }
0x1c61   :  { %v1217_v31 = vpop.permute.xlu0 %1216 }
0x1c62   :  { %2320 = vmatmul.mubr.msk.bf16.vlgmr.msra.gmra.mrb[24].mxu0 %vm230_vm6, %v1217_v31 }
0x1c63   :  { %2332 = vmatpush3.bf16.msra.mxu0 %v2872_v62  ;;  %2335 = vmatprep.mubr.msk.bf16.mxu0 %vm2579_vm0, %v2578_v1 }
0x1c64   :  { %2333 = vmatprep.subr.bf16.mxu0 %v2578_v1 }
0x1c67   :  { %2334 = vmatpush3.bf16.msra.mxu0 %v2879_v63 }
0x1c68   :  { %2347 = vmatprep.subr.bf16.mxu0 %v2578_v1 }
0x1d35   :  { %v1255_v34 = vpop.f32.mrb[24].mxu0 }
0x1d36   :  { %v1261_v35 = vadd.f32 %v1255_v34, %v1213_v32  ;;  %v2321_v36 = vpop.f32.mrb[25].mxu0 }
0x1d37   :  { %v1258_v37 = vpop.f32.mrb[26].mxu0 }
0x1d38   :  { %v2144_v38 = vmul.f32 -1.442695, %v1261_v35  ;;  %v2322_v39 = vpop.f32.mrb[27].mxu0 }
0x1d3a   :  { %2477 = vpow2.f32 %v2144_v38 }
0x1d3b   :  { %2479 = vtanh.f32 %v1261_v35 }
0x1d44   :  { %v2478_v40 = vpop.eup %2477 }
0x1d45   :  { %v1265_v41 = vadd.f32 1.0, %v2478_v40  ;;  %v2480_v42 = vpop.eup %2479 }
0x1d47   :  { %2481 = vrcp.f32 %v1265_v41 }
0x1d51   :  { %v2482_v43 = vpop.eup %2481 }
0x1d52   :  { %v1269_v44 = vsel %vm2727_vm5, %v2480_v42, %v2482_v43  ;;  %v1453_v43 = vld [vmem:[#allocation4 + $0xa] sm:$0x3] }
0x1d53   :  { %1272 = vrot.lane.b32.xlu1 %v1269_v44, %s2582_s3  ;;  %v1270_v48 = vmul.f32 %v1269_v44, %v1200_v25 }
0x1dc5   :  { %v1273_v46 = vpop.permute.xlu1 %1272 }
0x1dc6   :  { %v1275_v47 = vmul.f32 %v1273_v46, %v1269_v44 }
0x1dc8   :  { %1277 = vrot.lane.b32.xlu0 %v1275_v47, %s2583_s19 }
0x1e3a   :  { %v1278_v49 = vpop.permute.xlu0 %1277 }
0x1e3b   :  { %v1280_v50 = vadd.f32 %v1278_v49, %v1270_v48 }
0x1e3d   :  { %2483 = vtanh.f32 %v1280_v50 }
0x1e47   :  { %v2484_v51 = vpop.eup %2483 }
0x1e48   :  { %1283 = vrot.lane.b32.xlu1 %v2484_v51, %s2582_s3 }
0x1eba   :  { %v1284_v52 = vpop.permute.xlu1 %1283 }
0x1ebb   :  { %v2951_v53 = vmul.f32 %v1284_v52, %v1269_v44 }
0x1ebd   :  { %v1294_v54 = vpack.c.bf16 %v2951_v53, %v2951_v53 }
0x1ebf   :  { %1296 = vrot.lane.b32.xlu0 %v1294_v54, %s2583_s19 }
0x1f31   :  { %v1297_v56 = vpop.permute.xlu0 %1296 }
0x1f32   :  { %2328 = vmatmul.mubr.msk.bf16.vlgmr.msra.gmra.mrb[24].mxu1 %vm230_vm6, %v1297_v56 }
0x1f33   :  { %2340 = vmatpush3.bf16.msra.mxu1 %v2872_v62  ;;  %2343 = vmatprep.mubr.msk.bf16.mxu1 %vm2579_vm0, %v2578_v1 }
0x1f34   :  { %2341 = vmatprep.subr.bf16.mxu1 %v2578_v1 }
0x1f37   :  { %2342 = vmatpush3.bf16.msra.mxu1 %v2879_v63 }
0x1f38   :  { %2355 = vmatprep.subr.bf16.mxu1 %v2578_v1 }
0x2005   :  { %v1335_v14 = vpop.f32.mrb[24].mxu1 }
0x2006   :  { %v1341_v8 = vadd.f32 %v1335_v14, %v1293_v59  ;;  %v2329_v60 = vpop.f32.mrb[25].mxu1 }
0x2007   :  { %v1338_v6 = vpop.f32.mrb[26].mxu1 }
0x2008   :  { %v2146_v55 = vmul.f32 -1.442695, %v1341_v8  ;;  %v2330_v45 = vpop.f32.mrb[27].mxu1 }
0x200a   :  { %2485 = vpow2.f32 %v2146_v55 }
0x200b   :  { %2487 = vtanh.f32 %v1341_v8 }
0x2014   :  { %v2486_v61 = vpop.eup %2485 }
0x2015   :  { %v1345_v33 = vadd.f32 1.0, %v2486_v61  ;;  %v2488_v24 = vpop.eup %2487 }
0x2017   :  { %2489 = vrcp.f32 %v1345_v33 }
0x2021   :  { %v2490_v20 = vpop.eup %2489 }
0x2022   :  { %v1349_v2 = vsel %vm2727_vm5, %v2488_v24, %v2490_v20  ;;  %v1533_v24 = vld [vmem:[#allocation4 + $0xc] sm:$0x3] }
0x2023   :  { %1352 = vrot.lane.b32.xlu1 %v1349_v2, %s2582_s3  ;;  %v1350_v7 = vmul.f32 %v1349_v2, %v1280_v50 }
0x2095   :  { %v1353_v3 = vpop.permute.xlu1 %1352 }
0x2096   :  { %v1355_v5 = vmul.f32 %v1353_v3, %v1349_v2 }
0x2098   :  { %1357 = vrot.lane.b32.xlu0 %v1355_v5, %s2583_s19 }
0x210a   :  { %v1358_v9 = vpop.permute.xlu0 %1357 }
0x210b   :  { %v1360_v10 = vadd.f32 %v1358_v9, %v1350_v7 }
0x210d   :  { %2491 = vtanh.f32 %v1360_v10 }
0x2117   :  { %v2492_v11 = vpop.eup %2491 }
0x2118   :  { %1363 = vrot.lane.b32.xlu1 %v2492_v11, %s2582_s3 }
0x218a   :  { %v1364_v30 = vpop.permute.xlu1 %1363 }
0x218b   :  { %v2968_v12 = vmul.f32 %v1364_v30, %v1349_v2 }
0x218d   :  { %v1374_v13 = vpack.c.bf16 %v2968_v12, %v2968_v12 }
0x218f   :  { %1376 = vrot.lane.b32.xlu0 %v1374_v13, %s2583_s19 }
0x2201   :  { %v1377_v15 = vpop.permute.xlu0 %1376 }
0x2202   :  { %2336 = vmatmul.mubr.msk.bf16.vlgmr.msra.gmra.mrb[28].mxu0 %vm230_vm6, %v1377_v15 }
0x2203   :  { %2348 = vmatpush3.bf16.msra.mxu0 %v2872_v62  ;;  %2351 = vmatprep.mubr.msk.bf16.mxu0 %vm2579_vm0, %v2578_v1 }
0x2204   :  { %2349 = vmatprep.subr.bf16.mxu0 %v2578_v1 }
0x2207   :  { %2350 = vmatpush3.bf16.msra.mxu0 %v2879_v63 }
0x2208   :  { %2363 = vmatprep.subr.mxu0 %v2578_v1 }
0x22d5   :  { %v1415_v17 = vpop.f32.mrb[28].mxu0 }
0x22d6   :  { %v1421_v18 = vadd.f32 %v1415_v17, %v1373_v16  ;;  %v2337_v19 = vpop.f32.mrb[29].mxu0 }
0x22d7   :  { %v1418_v21 = vpop.f32.mrb[30].mxu0 }
0x22d8   :  { %v2148_v22 = vmul.f32 -1.442695, %v1421_v18  ;;  %v2338_v23 = vpop.f32.mrb[31].mxu0 }
0x22da   :  { %2493 = vpow2.f32 %v2148_v22 }
0x22db   :  { %2495 = vtanh.f32 %v1421_v18 }
0x22e4   :  { %v2494_v25 = vpop.eup %2493 }
0x22e5   :  { %v1425_v26 = vadd.f32 1.0, %v2494_v25  ;;  %v2496_v27 = vpop.eup %2495 }
0x22e7   :  { %2497 = vrcp.f32 %v1425_v26 }
0x22f1   :  { %v2498_v29 = vpop.eup %2497 }
0x22f2   :  { %v1429_v31 = vsel %vm2727_vm5, %v2496_v27, %v2498_v29  ;;  %v1613_v29 = vld [vmem:[#allocation4 + $0xe] sm:$0x3] }
0x22f3   :  { %1432 = vrot.lane.b32.xlu1 %v1429_v31, %s2582_s3  ;;  %v1430_v35 = vmul.f32 %v1429_v31, %v1360_v10 }
0x2365   :  { %v1433_v32 = vpop.permute.xlu1 %1432 }
0x2366   :  { %v1435_v34 = vmul.f32 %v1433_v32, %v1429_v31 }
0x2368   :  { %1437 = vrot.lane.b32.xlu0 %v1435_v34, %s2583_s19 }
0x23da   :  { %v1438_v36 = vpop.permute.xlu0 %1437 }
0x23db   :  { %v1440_v37 = vadd.f32 %v1438_v36, %v1430_v35 }
0x23dd   :  { %2499 = vtanh.f32 %v1440_v37 }
0x23e7   :  { %v2500_v38 = vpop.eup %2499 }
0x23e8   :  { %1443 = vrot.lane.b32.xlu1 %v2500_v38, %s2582_s3 }
0x245a   :  { %v1444_v39 = vpop.permute.xlu1 %1443 }
0x245b   :  { %v2985_v40 = vmul.f32 %v1444_v39, %v1429_v31 }
0x245d   :  { %v1454_v41 = vpack.c.bf16 %v2985_v40, %v2985_v40 }
0x245f   :  { %1456 = vrot.lane.b32.xlu0 %v1454_v41, %s2583_s19 }
0x24d1   :  { %v1457_v42 = vpop.permute.xlu0 %1456 }
0x24d2   :  { %2344 = vmatmul.mubr.msk.bf16.vlgmr.msra.gmra.mrb[28].mxu1 %vm230_vm6, %v1457_v42 }
0x24d3   :  { %2356 = vmatpush3.bf16.msra.mxu1 %v2872_v62  ;;  %2359 = vmatprep.mubr.msk.bf16.mxu1 %vm2579_vm0, %v2578_v1 }
0x24d4   :  { %2357 = vmatprep.subr.bf16.mxu1 %v2578_v1 }
0x24d7   :  { %2358 = vmatpush3.bf16.msra.mxu1 %v2879_v63 }
0x24d8   :  { %2373 = vmatprep.subr.bf16.mxu1 %v2578_v1 }
0x25a5   :  { %v1495_v44 = vpop.f32.mrb[28].mxu1 }
0x25a6   :  { %v1501_v46 = vadd.f32 %v1495_v44, %v1453_v43  ;;  %v2345_v47 = vpop.f32.mrb[29].mxu1 }
0x25a7   :  { %v1498_v48 = vpop.f32.mrb[30].mxu1 }
0x25a8   :  { %v2150_v49 = vmul.f32 -1.442695, %v1501_v46  ;;  %v2346_v50 = vpop.f32.mrb[31].mxu1 }
0x25aa   :  { %2501 = vpow2.f32 %v2150_v49 }
0x25ab   :  { %2503 = vtanh.f32 %v1501_v46 }
0x25b4   :  { %v2502_v51 = vpop.eup %2501 }
0x25b5   :  { %v1505_v52 = vadd.f32 1.0, %v2502_v51  ;;  %v2504_v62 = vpop.eup %2503 }
0x25b7   :  { %2505 = vrcp.f32 %v1505_v52 }
0x25c1   :  { %v2506_v54 = vpop.eup %2505 }
0x25c2   :  { %v1509_v56 = vsel %vm2727_vm5, %v2504_v62, %v2506_v54 }
0x25c3   :  { %1512 = vrot.lane.b32.xlu1 %v1509_v56, %s2582_s3  ;;  %v1510_v14 = vmul.f32 %v1509_v56, %v1440_v37 }
0x2635   :  { %v1513_v63 = vpop.permute.xlu1 %1512 }
0x2636   :  { %v1515_v59 = vmul.f32 %v1513_v63, %v1509_v56 }
0x2638   :  { %1517 = vrot.lane.b32.xlu0 %v1515_v59, %s2583_s19 }
0x26aa   :  { %v1518_v8 = vpop.permute.xlu0 %1517 }
0x26ab   :  { %v1520_v60 = vadd.f32 %v1518_v8, %v1510_v14 }
0x26ad   :  { %2507 = vtanh.f32 %v1520_v60 }
0x26b7   :  { %v2508_v6 = vpop.eup %2507 }
0x26b8   :  { %1523 = vrot.lane.b32.xlu1 %v2508_v6, %s2582_s3 }
0x272a   :  { %v1524_v55 = vpop.permute.xlu1 %1523 }
0x272b   :  { %v3002_v45 = vmul.f32 %v1524_v55, %v1509_v56 }
0x272d   :  { %v1534_v61 = vpack.c.bf16 %v3002_v45, %v3002_v45 }
0x272f   :  { %1536 = vrot.lane.b32.xlu0 %v1534_v61, %s2583_s19 }
0x27a1   :  { %v1537_v33 = vpop.permute.xlu0 %1536 }
0x27a2   :  { %2352 = vmatmul.mubr.msk.bf16.vlgmr.msra.gmra.mrb[32].mxu0 %vm230_vm6, %v1537_v33 }
0x27a3   :  { %2365 = vmatprep.mubr.msk.f32.mxu0 %vm2579_vm0, %v2578_v1 }
0x2875   :  { %v1575_v20 = vpop.f32.mrb[32].mxu0 }
0x2876   :  { %v1581_v2 = vadd.f32 %v1575_v20, %v1533_v24  ;;  %v2353_v3 = vpop.f32.mrb[33].mxu0 }
0x2877   :  { %v1578_v5 = vpop.f32.mrb[34].mxu0 }
0x2878   :  { %v2152_v7 = vmul.f32 -1.442695, %v1581_v2  ;;  %v2354_v9 = vpop.f32.mrb[35].mxu0 }
0x287a   :  { %2509 = vpow2.f32 %v2152_v7 }
0x287b   :  { %2511 = vtanh.f32 %v1581_v2 }
0x2884   :  { %v2510_v10 = vpop.eup %2509 }
0x2885   :  { %v1585_v11 = vadd.f32 1.0, %v2510_v10  ;;  %v2512_v30 = vpop.eup %2511 }
0x2887   :  { %2513 = vrcp.f32 %v1585_v11 }
0x2891   :  { %v2514_v13 = vpop.eup %2513 }
0x2892   :  { %v1589_v15 = vsel %vm2727_vm5, %v2512_v30, %v2514_v13 }
0x2893   :  { %1592 = vrot.lane.b32.xlu1 %v1589_v15, %s2582_s3  ;;  %v1590_v18 = vmul.f32 %v1589_v15, %v1520_v60 }
0x2905   :  { %v1593_v16 = vpop.permute.xlu1 %1592 }
0x2906   :  { %v1595_v17 = vmul.f32 %v1593_v16, %v1589_v15 }
0x2908   :  { %1597 = vrot.lane.b32.xlu0 %v1595_v17, %s2583_s19 }
0x297a   :  { %v1598_v19 = vpop.permute.xlu0 %1597 }
0x297b   :  { %v1600_v21 = vadd.f32 %v1598_v19, %v1590_v18 }
0x297d   :  { %2515 = vtanh.f32 %v1600_v21 }
0x2987   :  { %v2516_v22 = vpop.eup %2515 }
0x2988   :  { %1603 = vrot.lane.b32.xlu1 %v2516_v22, %s2582_s3 }
0x29fa   :  { %v1604_v23 = vpop.permute.xlu1 %1603 }
0x29fb   :  { %v1606_v25 = vmul.f32 %v1604_v23, %v1589_v15 }
0x29fd   :  { %v1614_v26 = vpack.c.bf16 %v1606_v25, %v1606_v25 }
0x29ff   :  { %1616 = vrot.lane.b32.xlu0 %v1614_v26, %s2583_s19 }
0x2a71   :  { %v1617_v27 = vpop.permute.xlu0 %1616 }
0x2a72   :  { %2360 = vmatmul.mubr.msk.bf16.vlgmr.msra.gmra.mrb[32].mxu1 %vm230_vm6, %v1617_v27 }
0x2a73   :  { %2377 = vmatprep.mubr.msk.bf16.mxu1 %vm2579_vm0, %v2578_v1 }
0x2b45   :  { %v1655_v31 = vpop.f32.mrb[32].mxu1 }
0x2b46   :  { %v1661_v32 = vadd.f32 %v1655_v31, %v1613_v29  ;;  %v2361_v34 = vpop.f32.mrb[33].mxu1 }
0x2b47   :  { %v1658_v35 = vpop.f32.mrb[34].mxu1 }
0x2b48   :  { %v2154_v36 = vmul.f32 -1.442695, %v1661_v32  ;;  %v2362_v37 = vpop.f32.mrb[35].mxu1 }
0x2b4a   :  { %2517 = vpow2.f32 %v2154_v36 }
0x2b4b   :  { %2519 = vtanh.f32 %v1661_v32 }
0x2b54   :  { %v2518_v38 = vpop.eup %2517 }
0x2b55   :  { %v1665_v39 = vadd.f32 1.0, %v2518_v38  ;;  %v2520_v41 = vpop.eup %2519 }
0x2b57   :  { %2521 = vrcp.f32 %v1665_v39 }
0x2b61   :  { %v2522_v42 = vpop.eup %2521 }
0x2b62   :  { %v1669_v43 = vsel %vm2727_vm5, %v2520_v41, %v2522_v42 }
0x2b63   :  { %1672 = vrot.lane.b32.xlu1 %v1669_v43, %s2582_s3  ;;  %v1670_v47 = vmul.f32 %v1669_v43, %v1600_v21 }
0x2bd5   :  { %v1673_v44 = vpop.permute.xlu1 %1672 }
0x2bd6   :  { %v1675_v46 = vmul.f32 %v1673_v44, %v1669_v43 }
0x2bd8   :  { %1677 = vrot.lane.b32.xlu0 %v1675_v46, %s2583_s19 }
0x2bdc   :  { %1129 = vrot.lane.b32.xlu0 %v2917_v0, %s2583_s19 }
0x2be0   :  { %1288 = vrot.lane.b32.xlu0 %v2951_v53, %s2583_s19 }
0x2be4   :  { %1448 = vrot.lane.b32.xlu0 %v2985_v40, %s2583_s19 }
0x2be8   :  { %1608 = vrot.lane.b32.xlu0 %v1606_v25, %s2583_s19 }
0x2c4a   :  { %v1678_v58 = vpop.permute.xlu0 %1677 }
0x2c4b   :  { %v1680_v48 = vadd.f32 %v1678_v58, %v1670_v47  ;;  %v1744_v58 = vsub.s32 %v2723_v57, %v2652_v4 }
0x2c4d   :  { %2523 = vtanh.f32 %v1680_v48 }
0x2c4e   :  { %v1130_v49 = vpop.permute.xlu0 %1129 }
0x2c4f   :  { %1132 = vst.msk [vmem:[#allocation3] sm:$0x3] %vm304_vm7, %v1130_v49 }
0x2c52   :  { %v1289_v50 = vpop.permute.xlu0 %1288 }
0x2c53   :  { %1292 = vst.msk [vmem:[#allocation3 + $0x4] sm:$0x3] %vm304_vm7, %v1289_v50 }
0x2c56   :  { %v1449_v51 = vpop.permute.xlu0 %1448  ;;  %v1693_v0 = vld [vmem:[#allocation3] sm:$0x3] }
0x2c57   :  { %v2524_v52 = vpop.eup %2523  ;;  %1452 = vst.msk [vmem:[#allocation3 + $0x8] sm:$0x3] %vm304_vm7, %v1449_v51  ;;  %v1701_v53 = vsel %vm304_vm7, %v1693_v0, 0.0  ;;  %v1931_v8 = vrot.slane %v1693_v0, 1 }
0x2c58   :  { %1702 = vadd.xlane.f32.xlu0 %v1701_v53  ;;  %1683 = vrot.lane.b32.xlu1 %v2524_v52, %s2582_s3 }
0x2c5a   :  { %v1609_v40 = vpop.permute.xlu0 %1608  ;;  %v1695_v62 = vld [vmem:[#allocation3 + $0x4] sm:$0x3] }
0x2c5b   :  { %1612 = vst.msk [vmem:[#allocation3 + $0xc] sm:$0x3] %vm304_vm7, %v1609_v40  ;;  %v1707_v54 = vsel %vm304_vm7, %v1695_v62, 0.0 }
0x2c5c   :  { %1708 = vadd.xlane.f32.xlu0 %v1707_v54  ;;  %1208 = vrot.lane.b32.xlu1 %v2934_v28, %s2583_s19  ;;  %v1933_v28 = vrot.slane %v1695_v62, 7 }
0x2c5e   :  { %v1697_v24 = vld [vmem:[#allocation3 + $0x8] sm:$0x3] }
0x2c5f   :  { %v1847_v9 = vrot.slane %v1697_v24, 4  ;;  %v1937_v10 = vrot.slane %v1697_v24, 5  ;;  %v1713_v32 = vsel %vm304_vm7, %v1697_v24, 0.0 }
0x2c60   :  { %1368 = vrot.lane.b32.xlu1 %v2968_v12, %s2583_s19 }
0x2c62   :  { %v1699_v13 = vld [vmem:[#allocation3 + $0xc] sm:$0x3] }
0x2c63   :  { %v1851_v22 = vrot.slane %v1699_v13, 2  ;;  %v1941_v23 = vrot.slane %v1699_v13, 3  ;;  %v1719_v34 = vsel %vm304_vm7, %v1699_v13, 0.0 }
0x2c64   :  { %1528 = vrot.lane.b32.xlu1 %v3002_v45, %s2583_s19  ;;  %v1843_v45 = vrot.slane %v1695_v62, 6 }
0x2cca   :  { %v1684_v56 = vpop.permute.xlu1 %1683 }
0x2ccb   :  { %v1686_v63 = vmul.f32 %v1684_v56, %v1669_v43 }
0x2ccd   :  { %1688 = vrot.lane.b32.xlu1 %v1686_v63, %s2583_s19 }
0x2cce   :  { %v1209_v59 = vpop.permute.xlu1 %1208 }
0x2ccf   :  { %1212 = vst.msk [vmem:[#allocation3 + $0x2] sm:$0x3] %vm304_vm7, %v1209_v59 }
0x2cd2   :  { %v1369_v14 = vpop.permute.xlu1 %1368 }
0x2cd3   :  { %1372 = vst.msk [vmem:[#allocation3 + $0x6] sm:$0x3] %vm304_vm7, %v1369_v14 }
0x2cd6   :  { %v1529_v60 = vpop.permute.xlu1 %1528  ;;  %v1694_v6 = vld [vmem:[#allocation3 + $0x2] sm:$0x3] }
0x2cd7   :  { %1532 = vst.msk [vmem:[#allocation3 + $0xa] sm:$0x3] %vm304_vm7, %v1529_v60  ;;  %v1841_v12 = vrot.slane %v1694_v6, 7  ;;  %v1932_v55 = vsel %vm1774_vm8, %v1694_v6, %v1931_v8  ;;  %v1704_v31 = vsel %vm304_vm7, %v1694_v6, 0.0 }
0x2cd8   :  { %v1934_v61 = vsel %vm1776_vm9, %v1933_v28, %v1932_v55 }
0x2cd9   :  { %v1842_v33 = vsel %vm1774_vm8, %v1841_v12, %v1693_v0 }
0x2cda   :  { %v1696_v20 = vld [vmem:[#allocation3 + $0x6] sm:$0x3]  ;;  %v1844_v2 = vsel %vm1776_vm9, %v1843_v45, %v1842_v33 }
0x2cdb   :  { %v1710_v3 = vsel %vm304_vm7, %v1696_v20, 0.0  ;;  %v1845_v5 = vrot.slane %v1696_v20, 5  ;;  %v1935_v7 = vrot.slane %v1696_v20, 6 }
0x2cdc   :  { %1711 = vadd.xlane.f32.xlu0 %v1710_v3 }
0x2cdd   :  { %v1936_v11 = vsel %vm1778_vm10, %v1935_v7, %v1934_v61  ;;  %v1846_v30 = vsel %vm1778_vm10, %v1845_v5, %v1844_v2 }
0x2cde   :  { %v1698_v15 = vld [vmem:[#allocation3 + $0xa] sm:$0x3]  ;;  %v1848_v16 = vsel %vm1780_vm11, %v1847_v9, %v1846_v30  ;;  %v1938_v17 = vsel %vm1780_vm11, %v1937_v10, %v1936_v11 }
0x2cdf   :  { %v1716_v18 = vsel %vm304_vm7, %v1698_v15, 0.0  ;;  %v1849_v19 = vrot.slane %v1698_v15, 3  ;;  %v1939_v21 = vrot.slane %v1698_v15, 4 }
0x2ce0   :  { %1717 = vadd.xlane.f32.xlu0 %v1716_v18  ;;  %v2396_v18 = vld [vmem:[%s3110_s7 + $0x8] sm:$0xff]  }
0x2ce1   :  { %v1850_v25 = vsel %vm1782_vm12, %v1849_v19, %v1848_v16  ;;  %v1940_v26 = vsel %vm1782_vm12, %v1939_v21, %v1938_v17  ;;  %v2395_v17 = vld [vmem:[%s3110_s7] sm:$0xff]   ;;  %s2551_s7 = scalar_lea.vmem %s2099_s12, 32 }
0x2ce2   :  { %v1852_v27 = vsel %vm1784_vm13, %v1851_v22, %v1850_v25  ;;  %v1942_v29 = vsel %vm1784_vm13, %v1941_v23, %v1940_v26  ;;  %2374 = vmatpush3.bf16.msra.mxu1 %v2395_v17  ;;  %p2552_p8 = scmp.ne.s32.totalorder %s2099_s12, %s2551_s7  ;;  %p2557_p10 = scmp.lt.s32.totalorder %s2551_s7, %s2551_s7 }
0x2ce3   :  { %2375 = vmatprep.subr.bf16.mxu1 %v2578_v1 }
0x2ce4   :  { %p2558_p11 = por %p2557_p10, %p2556_p9 }
0x2ce5   :  { %v1703_v43 = vpop.xlane.xlu0 %1702 }
0x2ce6   :  { %v1726_v48 = vmul.f32 0.03125, %v1703_v43  ;;  %2376 = vmatpush3.bf16.msra.mxu1 %v2396_v18  ;;  %p2559_p12 = pnand %p2558_p11, %p2552_p8 }
0x2ce8   :  { %v1745_v52 = vrot.slane %v1726_v48, %v1744_v58 }
0x2ce9   :  { %v1709_v47 = vpop.xlane.xlu0 %1708 }
0x2cea   :  { %v1728_v51 = vmul.f32 0.03125, %v1709_v47 }
0x2cec   :  { %v1753_v62 = vrot.slane %v1728_v51, %v1744_v58 }
0x2cf1   :  { %1705 = vadd.xlane.f32.xlu1 %v1704_v31 }
0x2cf5   :  { %1714 = vadd.xlane.f32.xlu1 %v1713_v32 }
0x2cf9   :  { %1720 = vadd.xlane.f32.xlu1 %v1719_v34 }
0x2d3f   :  { %v1689_v35 = vpop.permute.xlu1 %1688 }
0x2d40   :  { %1692 = vst.msk [vmem:[#allocation3 + $0xe] sm:$0x3] %vm304_vm7, %v1689_v35 }
0x2d47   :  { %v1700_v36 = vld [vmem:[#allocation3 + $0xe] sm:$0x3] }
0x2d48   :  { %v1722_v37 = vsel %vm304_vm7, %v1700_v36, 0.0  ;;  %v1853_v38 = vrot.slane %v1700_v36, 1  ;;  %v1943_v39 = vrot.slane %v1700_v36, 2 }
0x2d49   :  { %1723 = vadd.xlane.f32.xlu0 %v1722_v37 }
0x2d4a   :  { %v1854_v41 = vsel %vm1786_vm14, %v1853_v38, %v1852_v27  ;;  %v1944_v42 = vsel %vm1786_vm14, %v1943_v39, %v1942_v29  ;;  %v2157_v29 = vld [vmem:[%s3111_s8] ss:$0 sm:$0xff] }
0x2d4b   :  { %2364 = vmatpush3.msra.mxu0 %v1854_v41 }
0x2d4c   :  { %2368 = vmatprep.subr.mxu0 %v2578_v1 }
0x2d69   :  { %v1712_v0 = vpop.xlane.xlu0 %1711 }
0x2d6a   :  { %v1729_v53 = vmul.f32 0.03125, %v1712_v0 }
0x2d6c   :  { %v1757_v14 = vrot.slane %v1729_v53, %v1744_v58 }
0x2d6d   :  { %v1718_v63 = vpop.xlane.xlu0 %1717 }
0x2d6e   :  { %v1731_v60 = vmul.f32 0.03125, %v1718_v63 }
0x2d70   :  { %v1765_v55 = vrot.slane %v1731_v60, %v1744_v58 }
0x2d7e   :  { %v1706_v44 = vpop.xlane.xlu1 %1705 }
0x2d7f   :  { %v1727_v46 = vmul.f32 0.03125, %v1706_v44 }
0x2d81   :  { %v1749_v49 = vrot.slane %v1727_v46, %v1744_v58 }
0x2d82   :  { %v1715_v50 = vpop.xlane.xlu1 %1714 }
0x2d83   :  { %v1775_v40 = vsel %vm1774_vm8, %v1749_v49, %v1745_v52  ;;  %v1730_v54 = vmul.f32 0.03125, %v1715_v50 }
0x2d84   :  { %v1777_v59 = vsel %vm1776_vm9, %v1753_v62, %v1775_v40 }
0x2d85   :  { %v1761_v8 = vrot.slane %v1730_v54, %v1744_v58  ;;  %v1779_v4 = vsel %vm1778_vm10, %v1757_v14, %v1777_v59 }
0x2d86   :  { %v1721_v56 = vpop.xlane.xlu1 %1720 }
0x2d87   :  { %v1732_v28 = vmul.f32 0.03125, %v1721_v56  ;;  %v1781_v57 = vsel %vm1780_vm11, %v1761_v8, %v1779_v4 }
0x2d88   :  { %v1783_v33 = vsel %vm1782_vm12, %v1765_v55, %v1781_v57 }
0x2d89   :  { %v1769_v6 = vrot.slane %v1732_v28, %v1744_v58 }
0x2d8b   :  { %v1785_v24 = vsel %vm1784_vm13, %v1769_v6, %v1783_v33 }
0x2dd6   :  { %v1724_v12 = vpop.xlane.xlu0 %1723 }
0x2dd7   :  { %v1733_v45 = vmul.f32 0.03125, %v1724_v12 }
0x2dd9   :  { %v1773_v61 = vrot.slane %v1733_v45, %v1744_v58 }
0x2ddb   :  { %v1787_v20 = vsel %vm1786_vm14, %v1773_v61, %v1785_v24 }
0x2ddc   :  { %1789 = vxpose.xlu1.b32.start.end [1/1] (short) (narrow) %v1787_v20, 8 }
0x2e5c   :  { %v1805_v2 = vpop.trf.xlu1 }
0x2e5d   :  { %v1822_v3 = vsel %vm1821_vm15, %v1805_v2, -inf }
0x2e5e   :  { %1823 = vmax.xlane.f32.xlu0 %v1822_v3 }
0x2eeb   :  { %v1824_v5 = vpop.xlane.xlu0 %1823 }
0x2eec   :  { %v1825_v7 = vsub.f32 %v1805_v2, %v1824_v5 }
0x2eee   :  { %v1826_v9 = vmul.f32 1.442695, %v1825_v7 }
0x2ef0   :  { %2525 = vpow2.f32 %v1826_v9 }
0x2efa   :  { %v2526_v10 = vpop.eup %2525 }
0x2efb   :  { %v1828_v11 = vsel %vm1821_vm15, %v2526_v10, 0.0 }
0x2efc   :  { %1829 = vadd.xlane.f32.xlu0 %v1828_v11 }
0x2f89   :  { %v1830_v30 = vpop.xlane.xlu0 %1829 }
0x2f8a   :  { %2527 = vrcp.f32 %v1830_v30 }
0x2f94   :  { %v2528_v13 = vpop.eup %2527 }
0x2f95   :  { %v1832_v15 = vmul.f32 %v2528_v13, %v2526_v10 }
0x2f97   :  { %2366 = vmatmul.mubr.msk.f32.vlgmr.msra.gmra.mrb[36].mxu0 %vm1856_vm1, %v1832_v15  ;;  %v1930_v16 = vrot.slane %v1832_v15, 1 }
0x2f98   :  { %2369 = vmatpush3.msra.mxu0 %v1944_v42  ;;  %2370 = vmatprep.mubr.msk.f32.mxu0 %vm2579_vm0, %v2578_v1  ;;  %vm2090_vm0 = vcmask 25600  }
0x2f9b   :  { %2371 = vmatmul.mubr.msk.f32.vlgmr.msra.gmra.mrb[38].mxu0 %vm1856_vm1, %v1930_v16 }
0x306a   :  { %v1926_v19 = vpop.f32.mrb[36].mxu0 }
0x306b   :  { %v2367_v21 = vpop.f32.mrb[37].mxu0 }
0x306e   :  { %v2014_v22 = vpop.f32.mrb[38].mxu0 }
0x306f   :  { %v2019_v23 = vrot.slane %v2014_v22, 7  ;;  %v2372_v25 = vpop.f32.mrb[39].mxu0 }
0x3071   :  { %v2022_v26 = vsel %vm2021_vm2, %v1926_v19, %v2019_v23 }
0x3072   :  { %v2023_v27 = vpack.c.bf16 %v2022_v26, %v2022_v26 }
0x3074   :  { %2378 = vmatmul.mubr.msk.bf16.vlgmr.msra.gmra.mrb[36].mxu1 %vm230_vm6, %v2023_v27 }
0x3147   :  { %v2084_v1 = vpop.f32.mrb[36].mxu1 }
0x3148   :  { %v2085_v31 = vadd.f32 %v2157_v29, %v2084_v1  ;;  %v2379_v32 = vpop.f32.mrb[37].mxu1 }
0x3149   :  { %v2087_v34 = vpop.f32.mrb[38].mxu1 }
0x314a   :  { %v2380_v35 = vpop.f32.mrb[39].mxu1  ;;  %2091 = vst.msk [vmem:[#allocation8] sm:$0x3] %vm2090_vm0, %v2085_v31 }
0x314b   :  { %2562 = shalt.err (!%p2559_p12)
}
0x314c   :  { %s2563_s8 = scalar_lea.hbm %s3112_s9, 32 }
0x314d   :  { %p2564_p13 = scmp.ne.s32.totalorder %s3112_s9, %s2563_s8  ;;  %p2567_p0 = scmp.lt.u32.totalorder %s2563_s8, %s3112_s9 }
0x314f   :  { %p2569_p1 = pnand %p2567_p0, %p2564_p13 }
0x3151   :  { %2572 = shalt.err (!%p2569_p1)
}
0x3152   :  { %2101 = dma.vmem_to_hbm [thread:$0]  %s2099_s12, 32, %s3112_s9, [#allocation7]  }
0x3153   :  { %2575 = dma.done.wait [#allocation7], 32  }
0x3154   :  { %2576 = vsyncadd [#allocation7], 4294967264 }
0x3155   :  { %2105 = vsyncpa [#allocation6], 1 }
0x3156   :  { %2106 = vsyncpa [#allocation7], 1 }

</bundles_post_ra>
